<compile_context>
chip_gen: v6e
topology: v6e:2x2x1
jax: 0.10.0
libtpu: 0.0.40
codegen_flags: <defaults>
</compile_context>

<pallas_src>
import math
import jax
import jax.numpy as jnp
from jax.experimental import pallas as pl
from jax.experimental.pallas import tpu as pltpu


# ---------------------------------------------------------------------------
# VMEM budget (per generation)
# ---------------------------------------------------------------------------

def _vmem_limit_bytes():
    # ~75% of physical VMEM: 96 MiB on v5e/v6e (128 MiB), 48 MiB on v7x (64 MiB),
    # leaving headroom for Mosaic internal scratch and double-buffered blocks.
    try:
        cap = pltpu.get_tpu_info().vmem_capacity_bytes
        if cap:
            return int(cap) * 3 // 4
    except Exception:
        pass
    return 48 * 1024 * 1024


_VMEM_LIMIT = _vmem_limit_bytes()


# ---------------------------------------------------------------------------
# Pallas kernels
# ---------------------------------------------------------------------------

def _layer_norm(x, gamma, beta, eps=1e-5):
    mu = jnp.mean(x, axis=-1, keepdims=True)
    var = jnp.mean((x - mu) ** 2, axis=-1, keepdims=True)
    return (x - mu) * jax.lax.rsqrt(var + eps) * gamma + beta


def decoder_stack_kernel(x_ref, maskadd_ref,
                         wqkv_ref, bqkv_ref, wo_ref, bo_ref,
                         ln1_g_ref, ln1_b_ref,
                         w1_ref, b1_ref, w2_ref, b2_ref,
                         ln2_g_ref, ln2_b_ref,
                         y_ref, attn_ref):
    """Full decoder stack. Grid axis = layer index ("arbitrary", sequential).

    Activations are carried across layers in the resident output block y_ref
    (constant index_map -> VMEM-resident across the whole grid); per-layer
    weights arrive as squeezed (D, ...) blocks indexed by the layer axis so
    the next layer's weight DMA overlaps the current layer's compute.
    """
    layer = pl.program_id(0)
    nlayers = pl.num_programs(0)

    @pl.when(layer == 0)
    def _():
        y_ref[...] = x_ref[...]

    B, S, D = y_ref.shape
    scale = 1.0 / math.sqrt(D)

    x = y_ref[...]                                          # (B, S, D) f32
    x2 = x.reshape(B * S, D)                                # tile-aligned (S % 8 == 0)
    x2_bf = x2.astype(jnp.bfloat16)

    # --- fused QKV projection: one (B*S, D) x (D, 3D) matmul ---------------
    qkv = jnp.dot(x2_bf, wqkv_ref[...],
                  preferred_element_type=jnp.float32) + bqkv_ref[...]   # (B*S, 3D)
    q = qkv[:, :D].reshape(B, S, D).astype(jnp.bfloat16)
    k = qkv[:, D:2 * D].reshape(B, S, D).astype(jnp.bfloat16)
    v = qkv[:, 2 * D:].reshape(B, S, D).astype(jnp.bfloat16)

    # --- scores + precomputed additive causal/padding mask ------------------
    scores = jnp.einsum('bqd,bkd->bqk', q, k,
                        preferred_element_type=jnp.float32) * scale     # (B, S, S)
    scores = scores + maskadd_ref[...]

    # --- stabilized softmax (EUP exp + approx reciprocal) -------------------
    scores = scores - jnp.max(scores, axis=-1, keepdims=True)
    p = jnp.exp(scores)
    p = p * pl.reciprocal(jnp.sum(p, axis=-1, keepdims=True), approx=True)

    # --- attention output + output projection ------------------------------
    attn_out = jnp.einsum('bqk,bkd->bqd', p.astype(jnp.bfloat16), v,
                          preferred_element_type=jnp.float32)           # (B, S, D)
    attn_out2 = jnp.dot(attn_out.reshape(B * S, D).astype(jnp.bfloat16),
                        wo_ref[...],
                        preferred_element_type=jnp.float32) + bo_ref[...]

    # --- residual + LN1 -----------------------------------------------------
    h = _layer_norm(x2 + attn_out2, ln1_g_ref[...], ln1_b_ref[...])     # (B*S, D)

    # --- FFN (ReLU) + residual + LN2 ----------------------------------------
    f = jnp.maximum(
        jnp.dot(h.astype(jnp.bfloat16), w1_ref[...],
                preferred_element_type=jnp.float32) + b1_ref[...], 0.0)
    f = jnp.dot(f.astype(jnp.bfloat16), w2_ref[...],
                preferred_element_type=jnp.float32) + b2_ref[...]
    y = _layer_norm(h + f, ln2_g_ref[...], ln2_b_ref[...])              # (B*S, D)

    y_ref[...] = y.reshape(B, S, D)

    # Only the last layer's attention probabilities are needed by the model.
    @pl.when(layer == nlayers - 1)
    def _():
        attn_ref[...] = p.astype(attn_ref.dtype)


def out_proj_kernel(x_ref, w_ref, b_ref, o_ref):
    """Vocab projection for one vocab tile: (B*S, D) bf16 x (D, TILE_V) bf16."""
    o = jnp.dot(x_ref[...], w_ref[...],
                preferred_element_type=jnp.float32) + b_ref[...]
    o_ref[...] = o


# ---------------------------------------------------------------------------
# Wrappers
# ---------------------------------------------------------------------------

def run_decoder_stack(x, mask_add, p):
    """x: (B, S, D) f32, mask_add: (B, S, S) f32 additive mask,
    p: dict of stacked (num_blocks, ...) block params."""
    B, S, D = x.shape
    NB = p["wqkv"].shape[0]
    F = p["w1"].shape[2]

    def full3(shape):
        return pl.BlockSpec(shape, lambda l: (0, 0, 0))

    def layer2(d0, d1):
        # per-layer weight block: layer axis squeezed out of the kernel view
        return pl.BlockSpec((pl.Squeezed(), d0, d1), lambda l: (l, 0, 0))

    in_specs = [
        full3((B, S, D)),                               # x (read at layer 0, resident)
        full3((B, S, S)),                               # additive mask (resident)
        layer2(D, 3 * D), layer2(1, 3 * D),             # wqkv, bqkv
        layer2(D, D),     layer2(1, D),                 # wo, bo
        layer2(1, D),     layer2(1, D),                 # ln1 gamma, beta
        layer2(D, F),     layer2(1, F),                 # w1, b1
        layer2(F, D),     layer2(1, D),                 # w2, b2
        layer2(1, D),     layer2(1, D),                 # ln2 gamma, beta
    ]
    out_specs = [full3((B, S, D)), full3((B, S, S))]
    out_shape = (jax.ShapeDtypeStruct((B, S, D), jnp.float32),
                 jax.ShapeDtypeStruct((B, S, S), jnp.float32))

    return pl.pallas_call(
        decoder_stack_kernel,
        grid=(NB,),
        in_specs=in_specs,
        out_specs=out_specs,
        out_shape=out_shape,
        compiler_params=pltpu.CompilerParams(
            dimension_semantics=("arbitrary",),       # layers are sequential
            vmem_limit_bytes=_VMEM_LIMIT),
    )(x, mask_add,
      p["wqkv"], p["bqkv"], p["wo"], p["bo"],
      p["ln1_g"], p["ln1_b"],
      p["w1"], p["b1"], p["w2"], p["b2"],
      p["ln2_g"], p["ln2_b"])


def run_out_proj(y, w, b, *, tile_v=1024):
    """y: (B, S, D) f32, w: (D, V) bf16, b: (1, V) f32 -> (B, S, V) f32.

    V is padded to a multiple of tile_v (no full-V fallback tile), the rows
    are cast to bf16 once here, and the vocab axis is a "parallel" grid axis.
    """
    B, S, D = y.shape
    V = w.shape[1]
    M = B * S
    x2 = y.reshape(M, D).astype(jnp.bfloat16)            # cast once, resident rows

    n_tiles = pl.cdiv(V, tile_v)
    V_pad = n_tiles * tile_v
    if V_pad != V:
        w = jnp.pad(w, ((0, 0), (0, V_pad - V)))
        b = jnp.pad(b, ((0, 0), (0, V_pad - V)))

    logits = pl.pallas_call(
        out_proj_kernel,
        grid=(n_tiles,),
        in_specs=[
            pl.BlockSpec((M, D), lambda j: (0, 0)),      # rows resident (bf16)
            pl.BlockSpec((D, tile_v), lambda j: (0, j)), # stream vocab tiles
            pl.BlockSpec((1, tile_v), lambda j: (0, j)),
        ],
        out_specs=pl.BlockSpec((M, tile_v), lambda j: (0, j)),
        out_shape=jax.ShapeDtypeStruct((M, V_pad), jnp.float32),
        compiler_params=pltpu.CompilerParams(
            dimension_semantics=("parallel",),
            vmem_limit_bytes=_VMEM_LIMIT),
    )(x2, w, b)
    return logits.reshape(B, S, V_pad)[:, :, :V]


# ---------------------------------------------------------------------------
# Model: parameter init + forward (glue in plain JAX, compute in Pallas)
# ---------------------------------------------------------------------------

def init_params(key, *, d_model, ff_hidden, vocab_size, max_len,
                num_blocks, img_pixels):
    D, F, V, NB = d_model, ff_hidden, vocab_size, num_blocks
    keys = iter(jax.random.split(key, 16))
    nk = lambda: next(keys)
    std = 0.02

    def w_bf16(shape):
        return (jax.random.normal(nk(), shape, jnp.float32) * std).astype(jnp.bfloat16)

    params = {
        # CLIP stubs (deterministic replacements for the frozen CLIP encoders)
        "w_img": jax.random.normal(nk(), (img_pixels, D), jnp.float32) * std,
        "emb_table": jax.random.normal(nk(), (V, D), jnp.float32) * std,
        # learned positional encoding, same semantics as nn.Parameter(randn(...))
        "pos_enc": jax.random.normal(nk(), (1, max_len + 1, D), jnp.float32),
        # output projection (bf16 weight, f32 bias)
        "w_out": w_bf16((D, V)),
        "b_out": jnp.zeros((1, V), jnp.float32),
        # decoder blocks, stacked on a leading layer axis
        "stack": {
            "wqkv": w_bf16((NB, D, 3 * D)),
            "bqkv": jnp.zeros((NB, 1, 3 * D), jnp.float32),
            "wo": w_bf16((NB, D, D)),
            "bo": jnp.zeros((NB, 1, D), jnp.float32),
            "ln1_g": jnp.ones((NB, 1, D), jnp.float32),
            "ln1_b": jnp.zeros((NB, 1, D), jnp.float32),
            "w1": w_bf16((NB, D, F)),
            "b1": jnp.zeros((NB, 1, F), jnp.float32),
            "w2": w_bf16((NB, F, D)),
            "b2": jnp.zeros((NB, 1, D), jnp.float32),
            "ln2_g": jnp.ones((NB, 1, D), jnp.float32),
            "ln2_b": jnp.zeros((NB, 1, D), jnp.float32),
        },
    }
    return params


def flickr_forward(params, x):
    """x: dict with 'images' (B,3,H,W), 'input_ids' (B,L) int32,
    'attention_mask' (B,L) float32.  Returns (logits (B,L+1,V), attention)."""
    images = x["images"]
    input_ids = x["input_ids"]
    attention_mask = x["attention_mask"].astype(jnp.float32)
    B = images.shape[0]

    # ---- CLIP stubs (glue, plain JAX) ------------------------------------
    # TODO(synk): real CLIPModel / CLIPTextModelWithProjection are frozen
    # pretrained encoders with no Pallas equivalent here; replaced with
    # deterministic stubs producing identical output shapes.
    img_flat = images.reshape(B, -1)                                 # (B, C*H*W)
    image_embed = (img_flat @ params["w_img"])[:, None, :]           # (B, 1, D)
    caption_embed = params["emb_table"][input_ids]                   # (B, L, D)

    input_seq = jnp.concatenate([image_embed, caption_embed], axis=1)  # (B, S, D)
    S = input_seq.shape[1]

    image_attention = jnp.ones((B, 1), jnp.float32)
    ext_mask = jnp.concatenate([image_attention, attention_mask], axis=1)  # (B, S)

    # single-head (n_heads=1, the module default): whole-D attention
    input_seq = input_seq + params["pos_enc"][:, :S, :]

    # ---- pad S to a multiple of 8 (sublane-aligned reshapes; use 128 for a
    # fully lane-dense attention writeback at real max_len) ------------------
    S_pad = -(-S // 8) * 8
    pad = S_pad - S
    if pad:
        input_seq = jnp.pad(input_seq, ((0, 0), (0, pad), (0, 0)))
        ext_mask = jnp.pad(ext_mask, ((0, 0), (0, pad)))   # padded keys masked out

    # ---- precompute additive causal+padding mask once (resident in VMEM) ---
    row = jnp.arange(S_pad)[:, None]
    col = jnp.arange(S_pad)[None, :]
    causal = (col <= row)[None, :, :]                                  # (1, S, S)
    key_ok = ext_mask[:, None, :] > 0.5                                # (B, 1, S)
    mask_add = jnp.where(jnp.logical_and(causal, key_ok),
                         jnp.float32(0.0), jnp.float32(-1e9))          # (B, S, S)

    # ---- fused decoder stack + tiled vocab projection (Pallas) -------------
    y_pad, attn_pad = run_decoder_stack(input_seq, mask_add, params["stack"])
    logits_pad = run_out_proj(y_pad, params["w_out"], params["b_out"])

    logits = logits_pad[:, :S, :]
    attention = attn_pad[:, :S, :S]
    return logits, attention


# ---------------------------------------------------------------------------
# Main
# ---------------------------------------------------------------------------

if __name__ == "__main__":
    # small synthetic shapes consistent with the module's forward
    B = 2          # batch
    L = 8          # caption length  (module uses up to 77)
    D = 128        # d_model         (module default 512)
    FF = 4 * D     # ff_hidden_ratio = 4
    VOCAB = 512    # synthetic vocab (real CLIP tokenizer vocab is ~49k)
    MAX_LEN = 16
    NUM_BLOCKS = 2 # module default 6; kept small for a quick test
    C, H, W = 3, 16, 16

    key = jax.random.PRNGKey(0)
    k_params, k_img, k_ids = jax.random.split(key, 3)

    params = init_params(k_params, d_model=D, ff_hidden=FF, vocab_size=VOCAB,
                         max_len=MAX_LEN, num_blocks=NUM_BLOCKS,
                         img_pixels=C * H * W)

    images = jax.random.normal(k_img, (B, C, H, W), jnp.float32)
    input_ids = jax.random.randint(k_ids, (B, L), 0, VOCAB, jnp.int32)
    attention_mask = jnp.ones((B, L), jnp.float32).at[:, -2:].set(0.0)  # padding

    x = {"images": images, "input_ids": input_ids,
         "attention_mask": attention_mask}

    logits, attention = flickr_forward(params, x)
    jax.block_until_ready((logits, attention))

    assert logits.shape == (B, L + 1, VOCAB)
    assert attention.shape == (B, L + 1, L + 1)
    assert bool(jnp.all(jnp.isfinite(logits)))
    print("KERNEL_OK")
</pallas_src>

<mosaic_0001>
module attributes {stable_mosaic.version = 11 : i64} {
  func.func @decoder_stack_kernel(%arg0: i32, %arg1: memref<2x16x128xf32, #tpu.memory_space<vmem>>, %arg2: memref<2x16x16xf32, #tpu.memory_space<vmem>>, %arg3: memref<1x128x384xbf16, #tpu.memory_space<vmem>>, %arg4: memref<1x1x384xf32, #tpu.memory_space<vmem>>, %arg5: memref<1x128x128xbf16, #tpu.memory_space<vmem>>, %arg6: memref<1x1x128xf32, #tpu.memory_space<vmem>>, %arg7: memref<1x1x128xf32, #tpu.memory_space<vmem>>, %arg8: memref<1x1x128xf32, #tpu.memory_space<vmem>>, %arg9: memref<1x128x512xbf16, #tpu.memory_space<vmem>>, %arg10: memref<1x1x512xf32, #tpu.memory_space<vmem>>, %arg11: memref<1x512x128xbf16, #tpu.memory_space<vmem>>, %arg12: memref<1x1x128xf32, #tpu.memory_space<vmem>>, %arg13: memref<1x1x128xf32, #tpu.memory_space<vmem>>, %arg14: memref<1x1x128xf32, #tpu.memory_space<vmem>>, %arg15: memref<2x16x128xf32, #tpu.memory_space<vmem>>, %arg16: memref<2x16x16xf32, #tpu.memory_space<vmem>>) attributes {dimension_semantics = [#tpu.dimension_semantics<arbitrary>], iteration_bounds = array<i64: 2>, scalar_prefetch = 0 : i64, scratch_operands = 0 : i64, tpu.core_type = #tpu.core_type<tc>, window_params = [{pipeline_mode = #tpu.pipeline_mode<synchronous>, transform_indices = @transform_0, window_bounds = array<i64: 2, 16, 128>}, {pipeline_mode = #tpu.pipeline_mode<synchronous>, transform_indices = @transform_1, window_bounds = array<i64: 2, 16, 16>}, {transform_indices = @transform_2, window_bounds = array<i64: 1, 128, 384>}, {transform_indices = @transform_3, window_bounds = array<i64: 1, 1, 384>}, {transform_indices = @transform_4, window_bounds = array<i64: 1, 128, 128>}, {transform_indices = @transform_5, window_bounds = array<i64: 1, 1, 128>}, {transform_indices = @transform_6, window_bounds = array<i64: 1, 1, 128>}, {transform_indices = @transform_7, window_bounds = array<i64: 1, 1, 128>}, {transform_indices = @transform_8, window_bounds = array<i64: 1, 128, 512>}, {transform_indices = @transform_9, window_bounds = array<i64: 1, 1, 512>}, {transform_indices = @transform_10, window_bounds = array<i64: 1, 512, 128>}, {transform_indices = @transform_11, window_bounds = array<i64: 1, 1, 128>}, {transform_indices = @transform_12, window_bounds = array<i64: 1, 1, 128>}, {transform_indices = @transform_13, window_bounds = array<i64: 1, 1, 128>}, {pipeline_mode = #tpu.pipeline_mode<synchronous>, transform_indices = @transform_14, window_bounds = array<i64: 2, 16, 128>}, {pipeline_mode = #tpu.pipeline_mode<synchronous>, transform_indices = @transform_15, window_bounds = array<i64: 2, 16, 16>}]} {
    %c0_i32 = arith.constant 0 : i32
    %0 = arith.cmpi eq, %arg0, %c0_i32 : i32
    %1 = arith.extui %0 : i1 to i32
    %c0_i32_0 = arith.constant 0 : i32
    %2 = arith.cmpi ne, %1, %c0_i32_0 : i32
    scf.if %2 {
      %c0_65 = arith.constant 0 : index
      %c0_66 = arith.constant 0 : index
      %c0_67 = arith.constant 0 : index
      %125 = vector.load %arg1[%c0_65, %c0_66, %c0_67] : memref<2x16x128xf32, #tpu.memory_space<vmem>>, vector<2x16x128xf32>
      %c0_68 = arith.constant 0 : index
      %c0_69 = arith.constant 0 : index
      %c0_70 = arith.constant 0 : index
      %126 = vector.load %arg15[%c0_68, %c0_69, %c0_70] : memref<2x16x128xf32, #tpu.memory_space<vmem>>, vector<2x16x128xf32>
      tpu.vector_store %arg15[%c0_68, %c0_69, %c0_70], %125 {strides = array<i32>} : memref<2x16x128xf32, #tpu.memory_space<vmem>>, vector<2x16x128xf32>,
    } else {
    }
    %c0 = arith.constant 0 : index
    %c0_1 = arith.constant 0 : index
    %c0_2 = arith.constant 0 : index
    %3 = vector.load %arg15[%c0, %c0_1, %c0_2] : memref<2x16x128xf32, #tpu.memory_space<vmem>>, vector<2x16x128xf32>
    %4 = vector.shape_cast %3 : vector<2x16x128xf32> to vector<32x128xf32>
    %5 = arith.truncf %4 : vector<32x128xf32> to vector<32x128xbf16>
    %c0_3 = arith.constant 0 : index
    %c0_4 = arith.constant 0 : index
    %c0_5 = arith.constant 0 : index
    %6 = vector.load %arg3[%c0_3, %c0_4, %c0_5] : memref<1x128x384xbf16, #tpu.memory_space<vmem>>, vector<1x128x384xbf16>
    %7 = vector.shape_cast %6 : vector<1x128x384xbf16> to vector<128x384xbf16>
    %cst = arith.constant dense<0.000000e+00> : vector<32x384xf32>
    %8 = tpu.matmul %5, %7, %cst {dimension_numbers = #tpu.dot_dimension_numbers<[1], [0], [0], [1], [0, 0, 1, 1], [], []>} : vector<32x128xbf16>, vector<128x384xbf16>, vector<32x384xf32> -> vector<32x384xf32>
    %c0_6 = arith.constant 0 : index
    %c0_7 = arith.constant 0 : index
    %c0_8 = arith.constant 0 : index
    %9 = vector.load %arg4[%c0_6, %c0_7, %c0_8] : memref<1x1x384xf32, #tpu.memory_space<vmem>>, vector<1x1x384xf32>
    %10 = vector.shape_cast %9 : vector<1x1x384xf32> to vector<1x384xf32>
    %11 = vector.broadcast %10 : vector<1x384xf32> to vector<32x384xf32>
    %12 = arith.addf %8, %11 : vector<32x384xf32>
    %13 = vector.extract_strided_slice %12 {offsets = [0, 0], sizes = [32, 128], strides = [1, 1]} : vector<32x384xf32> to vector<32x128xf32>
    %14 = vector.shape_cast %13 : vector<32x128xf32> to vector<2x16x128xf32>
    %15 = arith.truncf %14 : vector<2x16x128xf32> to vector<2x16x128xbf16>
    %16 = vector.extract_strided_slice %12 {offsets = [0, 128], sizes = [32, 128], strides = [1, 1]} : vector<32x384xf32> to vector<32x128xf32>
    %17 = vector.shape_cast %16 : vector<32x128xf32> to vector<2x16x128xf32>
    %18 = arith.truncf %17 : vector<2x16x128xf32> to vector<2x16x128xbf16>
    %19 = vector.extract_strided_slice %12 {offsets = [0, 256], sizes = [32, 128], strides = [1, 1]} : vector<32x384xf32> to vector<32x128xf32>
    %20 = vector.shape_cast %19 : vector<32x128xf32> to vector<2x16x128xf32>
    %21 = arith.truncf %20 : vector<2x16x128xf32> to vector<2x16x128xbf16>
    "tpu.trace_start"() <{level = 10 : i32, message = "bqd,bkd->bqk"}> : () -> ()
    %cst_9 = arith.constant dense<0.000000e+00> : vector<2x16x16xf32>
    %22 = tpu.matmul %15, %18, %cst_9 {dimension_numbers = #tpu.dot_dimension_numbers<[2], [2], [1], [1], [0, 0, 0, 1, 1, 1], [0], [0]>} : vector<2x16x128xbf16>, vector<2x16x128xbf16>, vector<2x16x16xf32> -> vector<2x16x16xf32>
    "tpu.trace_stop"() : () -> ()
    %cst_10 = arith.constant 0.0883883461 : f32
    %23 = vector.broadcast %cst_10 : f32 to vector<2x16x16xf32>
    %24 = arith.mulf %22, %23 : vector<2x16x16xf32>
    %c0_11 = arith.constant 0 : index
    %c0_12 = arith.constant 0 : index
    %c0_13 = arith.constant 0 : index
    %25 = vector.load %arg2[%c0_11, %c0_12, %c0_13] : memref<2x16x16xf32, #tpu.memory_space<vmem>>, vector<2x16x16xf32>
    %26 = arith.addf %24, %25 : vector<2x16x16xf32>
    %cst_14 = arith.constant dense<0xFF800000> : vector<2x16xf32>
    %27 = vector.multi_reduction <maximumf>, %26, %cst_14 [2] : vector<2x16x16xf32> to vector<2x16xf32>
    %28 = vector.shape_cast %27 : vector<2x16xf32> to vector<2x16x1xf32>
    %29 = vector.broadcast %28 : vector<2x16x1xf32> to vector<2x16x16xf32>
    %30 = arith.subf %26, %29 : vector<2x16x16xf32>
    %31 = math.exp %30 : vector<2x16x16xf32>
    %cst_15 = arith.constant dense<0.000000e+00> : vector<2x16xf32>
    %32 = vector.multi_reduction <add>, %31, %cst_15 [2] : vector<2x16x16xf32> to vector<2x16xf32>
    %33 = vector.shape_cast %32 : vector<2x16xf32> to vector<2x16x1xf32>
    %34 = tpu.reciprocal %33 {approx = true} : vector<2x16x1xf32> -> vector<2x16x1xf32>
    %35 = vector.broadcast %34 : vector<2x16x1xf32> to vector<2x16x16xf32>
    %36 = arith.mulf %31, %35 : vector<2x16x16xf32>
    %37 = arith.truncf %36 : vector<2x16x16xf32> to vector<2x16x16xbf16>
    "tpu.trace_start"() <{level = 10 : i32, message = "bqk,bkd->bqd"}> : () -> ()
    %cst_16 = arith.constant dense<0.000000e+00> : vector<2x16x128xf32>
    %38 = tpu.matmul %37, %21, %cst_16 {dimension_numbers = #tpu.dot_dimension_numbers<[2], [1], [1], [2], [0, 0, 0, 1, 1, 2], [0], [0]>} : vector<2x16x16xbf16>, vector<2x16x128xbf16>, vector<2x16x128xf32> -> vector<2x16x128xf32>
    "tpu.trace_stop"() : () -> ()
    %39 = vector.shape_cast %38 : vector<2x16x128xf32> to vector<32x128xf32>
    %40 = arith.truncf %39 : vector<32x128xf32> to vector<32x128xbf16>
    %c0_17 = arith.constant 0 : index
    %c0_18 = arith.constant 0 : index
    %c0_19 = arith.constant 0 : index
    %41 = vector.load %arg5[%c0_17, %c0_18, %c0_19] : memref<1x128x128xbf16, #tpu.memory_space<vmem>>, vector<1x128x128xbf16>
    %42 = vector.shape_cast %41 : vector<1x128x128xbf16> to vector<128x128xbf16>
    %cst_20 = arith.constant dense<0.000000e+00> : vector<32x128xf32>
    %43 = tpu.matmul %40, %42, %cst_20 {dimension_numbers = #tpu.dot_dimension_numbers<[1], [0], [0], [1], [0, 0, 1, 1], [], []>} : vector<32x128xbf16>, vector<128x128xbf16>, vector<32x128xf32> -> vector<32x128xf32>
    %c0_21 = arith.constant 0 : index
    %c0_22 = arith.constant 0 : index
    %c0_23 = arith.constant 0 : index
    %44 = vector.load %arg6[%c0_21, %c0_22, %c0_23] : memref<1x1x128xf32, #tpu.memory_space<vmem>>, vector<1x1x128xf32>
    %45 = vector.shape_cast %44 : vector<1x1x128xf32> to vector<1x128xf32>
    %46 = vector.broadcast %45 : vector<1x128xf32> to vector<32x128xf32>
    %47 = arith.addf %43, %46 : vector<32x128xf32>
    %48 = arith.addf %4, %47 : vector<32x128xf32>
    %c0_24 = arith.constant 0 : index
    %c0_25 = arith.constant 0 : index
    %c0_26 = arith.constant 0 : index
    %49 = vector.load %arg7[%c0_24, %c0_25, %c0_26] : memref<1x1x128xf32, #tpu.memory_space<vmem>>, vector<1x1x128xf32>
    %50 = vector.shape_cast %49 : vector<1x1x128xf32> to vector<1x128xf32>
    %c0_27 = arith.constant 0 : index
    %c0_28 = arith.constant 0 : index
    %c0_29 = arith.constant 0 : index
    %51 = vector.load %arg8[%c0_27, %c0_28, %c0_29] : memref<1x1x128xf32, #tpu.memory_space<vmem>>, vector<1x1x128xf32>
    %52 = vector.shape_cast %51 : vector<1x1x128xf32> to vector<1x128xf32>
    %cst_30 = arith.constant dense<0.000000e+00> : vector<32xf32>
    %53 = vector.multi_reduction <add>, %48, %cst_30 [1] : vector<32x128xf32> to vector<32xf32>
    %54 = vector.shape_cast %53 : vector<32xf32> to vector<32x1xf32>
    %cst_31 = arith.constant 1.280000e+02 : f32
    %55 = vector.broadcast %cst_31 : f32 to vector<32x1xf32>
    %56 = arith.divf %54, %55 : vector<32x1xf32>
    %57 = vector.broadcast %56 : vector<32x1xf32> to vector<32x128xf32>
    %58 = arith.subf %48, %57 : vector<32x128xf32>
    %59 = arith.mulf %58, %58 : vector<32x128xf32>
    %cst_32 = arith.constant dense<0.000000e+00> : vector<32xf32>
    %60 = vector.multi_reduction <add>, %59, %cst_32 [1] : vector<32x128xf32> to vector<32xf32>
    %61 = vector.shape_cast %60 : vector<32xf32> to vector<32x1xf32>
    %cst_33 = arith.constant 1.280000e+02 : f32
    %62 = vector.broadcast %cst_33 : f32 to vector<32x1xf32>
    %63 = arith.divf %61, %62 : vector<32x1xf32>
    %64 = vector.broadcast %56 : vector<32x1xf32> to vector<32x128xf32>
    %65 = arith.subf %48, %64 : vector<32x128xf32>
    %cst_34 = arith.constant 9.99999974E-6 : f32
    %66 = vector.broadcast %cst_34 : f32 to vector<32x1xf32>
    %67 = arith.addf %63, %66 : vector<32x1xf32>
    %68 = math.rsqrt %67 : vector<32x1xf32>
    %69 = vector.broadcast %68 : vector<32x1xf32> to vector<32x128xf32>
    %70 = arith.mulf %65, %69 : vector<32x128xf32>
    %71 = vector.broadcast %50 : vector<1x128xf32> to vector<32x128xf32>
    %72 = arith.mulf %70, %71 : vector<32x128xf32>
    %73 = vector.broadcast %52 : vector<1x128xf32> to vector<32x128xf32>
    %74 = arith.addf %72, %73 : vector<32x128xf32>
    %75 = arith.truncf %74 : vector<32x128xf32> to vector<32x128xbf16>
    %c0_35 = arith.constant 0 : index
    %c0_36 = arith.constant 0 : index
    %c0_37 = arith.constant 0 : index
    %76 = vector.load %arg9[%c0_35, %c0_36, %c0_37] : memref<1x128x512xbf16, #tpu.memory_space<vmem>>, vector<1x128x512xbf16>
    %77 = vector.shape_cast %76 : vector<1x128x512xbf16> to vector<128x512xbf16>
    %cst_38 = arith.constant dense<0.000000e+00> : vector<32x512xf32>
    %78 = tpu.matmul %75, %77, %cst_38 {dimension_numbers = #tpu.dot_dimension_numbers<[1], [0], [0], [1], [0, 0, 1, 1], [], []>} : vector<32x128xbf16>, vector<128x512xbf16>, vector<32x512xf32> -> vector<32x512xf32>
    %c0_39 = arith.constant 0 : index
    %c0_40 = arith.constant 0 : index
    %c0_41 = arith.constant 0 : index
    %79 = vector.load %arg10[%c0_39, %c0_40, %c0_41] : memref<1x1x512xf32, #tpu.memory_space<vmem>>, vector<1x1x512xf32>
    %80 = vector.shape_cast %79 : vector<1x1x512xf32> to vector<1x512xf32>
    %81 = vector.broadcast %80 : vector<1x512xf32> to vector<32x512xf32>
    %82 = arith.addf %78, %81 : vector<32x512xf32>
    %cst_42 = arith.constant 0.000000e+00 : f32
    %83 = vector.broadcast %cst_42 : f32 to vector<32x512xf32>
    %84 = arith.maximumf %82, %83 : vector<32x512xf32>
    %85 = arith.truncf %84 : vector<32x512xf32> to vector<32x512xbf16>
    %c0_43 = arith.constant 0 : index
    %c0_44 = arith.constant 0 : index
    %c0_45 = arith.constant 0 : index
    %86 = vector.load %arg11[%c0_43, %c0_44, %c0_45] : memref<1x512x128xbf16, #tpu.memory_space<vmem>>, vector<1x512x128xbf16>
    %87 = vector.shape_cast %86 : vector<1x512x128xbf16> to vector<512x128xbf16>
    %cst_46 = arith.constant dense<0.000000e+00> : vector<32x128xf32>
    %88 = tpu.matmul %85, %87, %cst_46 {dimension_numbers = #tpu.dot_dimension_numbers<[1], [0], [0], [1], [0, 0, 1, 1], [], []>} : vector<32x512xbf16>, vector<512x128xbf16>, vector<32x128xf32> -> vector<32x128xf32>
    %c0_47 = arith.constant 0 : index
    %c0_48 = arith.constant 0 : index
    %c0_49 = arith.constant 0 : index
    %89 = vector.load %arg12[%c0_47, %c0_48, %c0_49] : memref<1x1x128xf32, #tpu.memory_space<vmem>>, vector<1x1x128xf32>
    %90 = vector.shape_cast %89 : vector<1x1x128xf32> to vector<1x128xf32>
    %91 = vector.broadcast %90 : vector<1x128xf32> to vector<32x128xf32>
    %92 = arith.addf %88, %91 : vector<32x128xf32>
    %93 = arith.addf %74, %92 : vector<32x128xf32>
    %c0_50 = arith.constant 0 : index
    %c0_51 = arith.constant 0 : index
    %c0_52 = arith.constant 0 : index
    %94 = vector.load %arg13[%c0_50, %c0_51, %c0_52] : memref<1x1x128xf32, #tpu.memory_space<vmem>>, vector<1x1x128xf32>
    %95 = vector.shape_cast %94 : vector<1x1x128xf32> to vector<1x128xf32>
    %c0_53 = arith.constant 0 : index
    %c0_54 = arith.constant 0 : index
    %c0_55 = arith.constant 0 : index
    %96 = vector.load %arg14[%c0_53, %c0_54, %c0_55] : memref<1x1x128xf32, #tpu.memory_space<vmem>>, vector<1x1x128xf32>
    %97 = vector.shape_cast %96 : vector<1x1x128xf32> to vector<1x128xf32>
    %cst_56 = arith.constant dense<0.000000e+00> : vector<32xf32>
    %98 = vector.multi_reduction <add>, %93, %cst_56 [1] : vector<32x128xf32> to vector<32xf32>
    %99 = vector.shape_cast %98 : vector<32xf32> to vector<32x1xf32>
    %cst_57 = arith.constant 1.280000e+02 : f32
    %100 = vector.broadcast %cst_57 : f32 to vector<32x1xf32>
    %101 = arith.divf %99, %100 : vector<32x1xf32>
    %102 = vector.broadcast %101 : vector<32x1xf32> to vector<32x128xf32>
    %103 = arith.subf %93, %102 : vector<32x128xf32>
    %104 = arith.mulf %103, %103 : vector<32x128xf32>
    %cst_58 = arith.constant dense<0.000000e+00> : vector<32xf32>
    %105 = vector.multi_reduction <add>, %104, %cst_58 [1] : vector<32x128xf32> to vector<32xf32>
    %106 = vector.shape_cast %105 : vector<32xf32> to vector<32x1xf32>
    %cst_59 = arith.constant 1.280000e+02 : f32
    %107 = vector.broadcast %cst_59 : f32 to vector<32x1xf32>
    %108 = arith.divf %106, %107 : vector<32x1xf32>
    %109 = vector.broadcast %101 : vector<32x1xf32> to vector<32x128xf32>
    %110 = arith.subf %93, %109 : vector<32x128xf32>
    %cst_60 = arith.constant 9.99999974E-6 : f32
    %111 = vector.broadcast %cst_60 : f32 to vector<32x1xf32>
    %112 = arith.addf %108, %111 : vector<32x1xf32>
    %113 = math.rsqrt %112 : vector<32x1xf32>
    %114 = vector.broadcast %113 : vector<32x1xf32> to vector<32x128xf32>
    %115 = arith.mulf %110, %114 : vector<32x128xf32>
    %116 = vector.broadcast %95 : vector<1x128xf32> to vector<32x128xf32>
    %117 = arith.mulf %115, %116 : vector<32x128xf32>
    %118 = vector.broadcast %97 : vector<1x128xf32> to vector<32x128xf32>
    %119 = arith.addf %117, %118 : vector<32x128xf32>
    %120 = vector.shape_cast %119 : vector<32x128xf32> to vector<2x16x128xf32>
    %c0_61 = arith.constant 0 : index
    %c0_62 = arith.constant 0 : index
    %c0_63 = arith.constant 0 : index
    %121 = vector.load %arg15[%c0_61, %c0_62, %c0_63] : memref<2x16x128xf32, #tpu.memory_space<vmem>>, vector<2x16x128xf32>
    tpu.vector_store %arg15[%c0_61, %c0_62, %c0_63], %120 {strides = array<i32>} : memref<2x16x128xf32, #tpu.memory_space<vmem>>, vector<2x16x128xf32>,
    %c1_i32 = arith.constant 1 : i32
    %122 = arith.cmpi eq, %arg0, %c1_i32 : i32
    %123 = arith.extui %122 : i1 to i32
    %c0_i32_64 = arith.constant 0 : i32
    %124 = arith.cmpi ne, %123, %c0_i32_64 : i32
    scf.if %124 {
      %c0_65 = arith.constant 0 : index
      %c0_66 = arith.constant 0 : index
      %c0_67 = arith.constant 0 : index
      %125 = vector.load %arg16[%c0_65, %c0_66, %c0_67] : memref<2x16x16xf32, #tpu.memory_space<vmem>>, vector<2x16x16xf32>
      tpu.vector_store %arg16[%c0_65, %c0_66, %c0_67], %36 {strides = array<i32>} : memref<2x16x16xf32, #tpu.memory_space<vmem>>, vector<2x16x16xf32>,
    } else {
    }
    return
  }
  func.func @transform_0(%arg0: i32) -> (i32, i32, i32) {
    %c0_i32 = arith.constant 0 : i32
    %c0_i32_0 = arith.constant 0 : i32
    %c0_i32_1 = arith.constant 0 : i32
    %c0_i32_2 = arith.constant 0 : i32
    return %c0_i32, %c0_i32_0, %c0_i32_1 : i32, i32, i32
  }
  func.func @transform_1(%arg0: i32) -> (i32, i32, i32) {
    %c0_i32 = arith.constant 0 : i32
    %c0_i32_0 = arith.constant 0 : i32
    %c0_i32_1 = arith.constant 0 : i32
    %c0_i32_2 = arith.constant 0 : i32
    return %c0_i32, %c0_i32_0, %c0_i32_1 : i32, i32, i32
  }
  func.func @transform_2(%arg0: i32) -> (i32, i32, i32) {
    %c0_i32 = arith.constant 0 : i32
    %c0_i32_0 = arith.constant 0 : i32
    %c0_i32_1 = arith.constant 0 : i32
    return %arg0, %c0_i32, %c0_i32_0 : i32, i32, i32
  }
  func.func @transform_3(%arg0: i32) -> (i32, i32, i32) {
    %c0_i32 = arith.constant 0 : i32
    %c0_i32_0 = arith.constant 0 : i32
    %c0_i32_1 = arith.constant 0 : i32
    return %arg0, %c0_i32, %c0_i32_0 : i32, i32, i32
  }
  func.func @transform_4(%arg0: i32) -> (i32, i32, i32) {
    %c0_i32 = arith.constant 0 : i32
    %c0_i32_0 = arith.constant 0 : i32
    %c0_i32_1 = arith.constant 0 : i32
    return %arg0, %c0_i32, %c0_i32_0 : i32, i32, i32
  }
  func.func @transform_5(%arg0: i32) -> (i32, i32, i32) {
    %c0_i32 = arith.constant 0 : i32
    %c0_i32_0 = arith.constant 0 : i32
    %c0_i32_1 = arith.constant 0 : i32
    return %arg0, %c0_i32, %c0_i32_0 : i32, i32, i32
  }
  func.func @transform_6(%arg0: i32) -> (i32, i32, i32) {
    %c0_i32 = arith.constant 0 : i32
    %c0_i32_0 = arith.constant 0 : i32
    %c0_i32_1 = arith.constant 0 : i32
    return %arg0, %c0_i32, %c0_i32_0 : i32, i32, i32
  }
  func.func @transform_7(%arg0: i32) -> (i32, i32, i32) {
    %c0_i32 = arith.constant 0 : i32
    %c0_i32_0 = arith.constant 0 : i32
    %c0_i32_1 = arith.constant 0 : i32
    return %arg0, %c0_i32, %c0_i32_0 : i32, i32, i32
  }
  func.func @transform_8(%arg0: i32) -> (i32, i32, i32) {
    %c0_i32 = arith.constant 0 : i32
    %c0_i32_0 = arith.constant 0 : i32
    %c0_i32_1 = arith.constant 0 : i32
    return %arg0, %c0_i32, %c0_i32_0 : i32, i32, i32
  }
  func.func @transform_9(%arg0: i32) -> (i32, i32, i32) {
    %c0_i32 = arith.constant 0 : i32
    %c0_i32_0 = arith.constant 0 : i32
    %c0_i32_1 = arith.constant 0 : i32
    return %arg0, %c0_i32, %c0_i32_0 : i32, i32, i32
  }
  func.func @transform_10(%arg0: i32) -> (i32, i32, i32) {
    %c0_i32 = arith.constant 0 : i32
    %c0_i32_0 = arith.constant 0 : i32
    %c0_i32_1 = arith.constant 0 : i32
    return %arg0, %c0_i32, %c0_i32_0 : i32, i32, i32
  }
  func.func @transform_11(%arg0: i32) -> (i32, i32, i32) {
    %c0_i32 = arith.constant 0 : i32
    %c0_i32_0 = arith.constant 0 : i32
    %c0_i32_1 = arith.constant 0 : i32
    return %arg0, %c0_i32, %c0_i32_0 : i32, i32, i32
  }
  func.func @transform_12(%arg0: i32) -> (i32, i32, i32) {
    %c0_i32 = arith.constant 0 : i32
    %c0_i32_0 = arith.constant 0 : i32
    %c0_i32_1 = arith.constant 0 : i32
    return %arg0, %c0_i32, %c0_i32_0 : i32, i32, i32
  }
  func.func @transform_13(%arg0: i32) -> (i32, i32, i32) {
    %c0_i32 = arith.constant 0 : i32
    %c0_i32_0 = arith.constant 0 : i32
    %c0_i32_1 = arith.constant 0 : i32
    return %arg0, %c0_i32, %c0_i32_0 : i32, i32, i32
  }
  func.func @transform_14(%arg0: i32) -> (i32, i32, i32) {
    %c0_i32 = arith.constant 0 : i32
    %c0_i32_0 = arith.constant 0 : i32
    %c0_i32_1 = arith.constant 0 : i32
    %c0_i32_2 = arith.constant 0 : i32
    return %c0_i32, %c0_i32_0, %c0_i32_1 : i32, i32, i32
  }
  func.func @transform_15(%arg0: i32) -> (i32, i32, i32) {
    %c0_i32 = arith.constant 0 : i32
    %c0_i32_0 = arith.constant 0 : i32
    %c0_i32_1 = arith.constant 0 : i32
    %c0_i32_2 = arith.constant 0 : i32
    return %c0_i32, %c0_i32_0, %c0_i32_1 : i32, i32, i32
  }
}

</mosaic_0001>

<bundles_post_ra>
// kernel: tpu_custom_call.1
= control target key start
LH: loop header
LB: loop body
LE: loop exit
PB: predicated region body
PF: predicated region fallthrough
CT: control target
= control target key end

     0   :  { %s4085_s0 = inlined_call_operand.hbm [shape: f32[2,16,128], index: 0, kind: input, shape index: {}]   ;;  %s4086_s1 = inlined_call_operand.hbm [shape: f32[2,16,16], index: 1, kind: input, shape index: {}]   ;;  %s4087_s2 = inlined_call_operand.hbm [shape: bf16[2,128,384], index: 2, kind: input, shape index: {}]   ;;  %s4088_s3 = inlined_call_operand.hbm [shape: f32[2,1,384], index: 3, kind: input, shape index: {}]   ;;  %s4089_s4 = inlined_call_operand.hbm [shape: bf16[2,128,128], index: 4, kind: input, shape index: {}]   ;;  %s4090_s5 = inlined_call_operand.vmem [shape: f32[2,1,128], index: 5, kind: input, shape index: {}]   ;;  %s4091_s6 = inlined_call_operand.vmem [shape: f32[2,1,128], index: 6, kind: input, shape index: {}]   ;;  %s4092_s7 = inlined_call_operand.vmem [shape: f32[2,1,128], index: 7, kind: input, shape index: {}]   ;;  %s4093_s8 = inlined_call_operand.hbm [shape: bf16[2,128,512], index: 8, kind: input, shape index: {}]   ;;  %s4094_s9 = inlined_call_operand.vmem [shape: f32[2,1,512], index: 9, kind: input, shape index: {}]   ;;  %s4095_s10 = inlined_call_operand.hbm [shape: bf16[2,512,128], index: 10, kind: input, shape index: {}]   ;;  %s4096_s11 = inlined_call_operand.vmem [shape: f32[2,1,128], index: 11, kind: input, shape index: {}]   ;;  %s4097_s12 = inlined_call_operand.vmem [shape: f32[2,1,128], index: 12, kind: input, shape index: {}]   ;;  %s4098_s13 = inlined_call_operand.vmem [shape: f32[2,1,128], index: 13, kind: input, shape index: {}]   ;;  %s4099_s14 = inlined_call_operand.hbm [shape: f32[2,16,128], index: 14, kind: output, shape index: {0}]   ;;  %s4100_s15 = inlined_call_operand.hbm [shape: f32[2,16,16], index: 15, kind: output, shape index: {1}]  }
   0x1   :  { %4112 = sst [smem:[#allocation23_spill]] %s4085_s0 }
   0x2   :  { %4113 = sst [smem:[#allocation24_spill]] %s4086_s1 }
   0x3   :  { %4114 = sst [smem:[#allocation25_spill]] %s4087_s2 }
   0x4   :  { %4115 = sst [smem:[#allocation26_spill]] %s4088_s3 }
   0x5   :  { %4116 = sst [smem:[#allocation27_spill]] %s4090_s5 }
   0x6   :  { %4117 = sst [smem:[#allocation28_spill]] %s4091_s6 }
   0x7   :  { %4118 = sst [smem:[#allocation29_spill]] %s4092_s7 }
   0x8   :  { %4119 = sst [smem:[#allocation30_spill]] %s4094_s9 }
   0x9   :  { %4120 = sst [smem:[#allocation31_spill]] %s4096_s11 }
   0xa   :  { %4121 = sst [smem:[#allocation32_spill]] %s4097_s12 }
   0xb   :  { %4122 = sst [smem:[#allocation33_spill]] %s4098_s13 }
   0xc   :  { %4123 = sst [smem:[#allocation34_spill]] %s4099_s14 }
   0xd   :  { %4124 = sst [smem:[#allocation35_spill]] %s4100_s15 }
   0xe   :  { %21 = vsyncpa [#allocation3], 0 }
   0xf   :  { %22 = vsyncpa [#allocation6], 0 }
  0x10   :  { %23 = vsyncpa [#allocation4], 0 }
  0x11   :  { %24 = vsyncpa [#allocation14], 0  ;;  %s3482_s18 = smov 0   ;;  %s3484_s19 = smov 0  }
  0x12   :  { %s3486_s20 = smov 0   ;;  %s3488_s21 = smov 0  }
  0x13 LB: > { %4125 = sst [smem:[#allocation20_spill]] %s3374_s20  ;;  %s3501_s22 = sadd.s32 4294967295, %s3378_s21   ;;  %s3378_s21 = sphi %s3488_s21, %s4166_s21   ;;  %s3374_s20 = sphi %s3486_s20, %s4168_s20   ;;  %s3370_s19 = sphi %s3484_s19, %s4170_s19   ;;  %s3366_s18 = sphi %s3482_s18, %s4169_s18  }
  0x14   : > { %s3504_s23 = sadd.s32 1, %s3378_s21   ;;  %s79_s25 = sadd.s32 1, %s3374_s20 }
  0x15   : > { %4126 = sst [smem:[#allocation21_spill]] %s3504_s23  ;;  %s76_s24 = ssub.s32 %s3378_s21, %s3504_s23 }
  0x16   : > { %p77_p0 = scmp.eq.s32.totalorder %s76_s24, 0  ;;  %p86_p1 = scmp.ne.s32.totalorder %s3374_s20, %s3370_s19 }
  0x17   : > { %p87_p2 = scmp.eq.s32.totalorder %s3378_s21, 0  ;;  %p92_p3 = scmp.ne.s32.totalorder %s3370_s19, %s3366_s18 }
  0x18   : > { %s3514_s26 = scalar_select %p77_p0, %s3374_s20, %s79_s25  }
  0x19   : > { %p3516_p4 = por %p87_p2, %p86_p1  ;;  %p4101_p5 = scmp.eq.s32.totalorder %s3501_s22, 0 }
  0x1a   : > { %4127 = sst [smem:[#allocation22_spill]] %s3514_s26  ;;  %p2538_p6 = scmp.ge.s32.totalorder %s3378_s21, 1 }
  0x1b   : > { %p431_p7 = scmp.lt.s32.totalorder %s3378_s21, 3  ;;  %p3525_p8 = por %p4101_p5, %p92_p3 }
  0x1c   : > { %s3380_s30 = smov [#allocation2]   ;;  %p2880_p13 = scmp.lt.s32.totalorder %s3378_s21, 2 }
  0x1d   : > { %s4129_s28 = scalar_select %p3525_p8, 1, 0 }
  0x1e   : > { %p3530_p10 = pnand %p2538_p6, %p431_p7  ;;  %s443_s16 = sshll.u32 %s3380_s30, 4  ;;  %s444_s16 = int_to_ptr.vmem [resolvable:$true] %s443_s16 }
  0x1f   : > { %s470_s18 = sand.u32 1, %s3378_s21   ;;  %s3545_s24 = sand.u32 1, %s3374_s20  }
  0x20   : > { %s4130_s29 = scalar_select %p3530_p10, 1, 0 }
  0x21   : > { %p2855_p11 = pneg %p3530_p10  ;;  %p3549_p0 = pnand %p2880_p13, %p3516_p4 }
  0x22   : > { %s3099_s30 = scalar_lea.vmem %s444_s16, 512  ;;  %p3107_p7 = scmp.lt.s32.totalorder %s444_s16, %s444_s16 }
  0x23   : > { %p3538_p12 = pnand %p2855_p11, %p4101_p5  ;;  %p3100_p2 = scmp.ne.s32.totalorder %s444_s16, %s3099_s30 }
  0x24   : > { %p3108_p11 = scmp.lt.s32.totalorder %s3099_s30, %s3099_s30 }
  0x25   : > { %s4131_s17 = scalar_select %p3538_p12, 1, 0 }
  0x26   : > { %p4105_p1 = pneg %p3538_p12  ;;  %p3109_p9 = por %p3108_p11, %p3107_p7 }
  0x28   : > { %p3102_p3 = pnand %p3100_p2, %p4105_p1 }
  0x2a   : > { %p3103_p6 = pneg %p3102_p3 }
  0x2c   : > { %p3110_p5 = pnand %p3109_p9, %p3103_p6 }
  0x2e   : > { %3113 = shalt.err (!%p3110_p5)
}
  0x2f   : > { %s4110_s26 = smov 128   ;;  %s4111_s27 = smov 8  }
  0x30   : > { %s4133_s0 = sld [smem:[#allocation23_spill]]  ;;  %s2823_s15 = smul.u32 192, %s3545_s24 }
  0x31   : > { %s2824_s30 = smul.u32 3072, %s3378_s21  ;;  %s4134_s2 = sld [smem:[#allocation25_spill]] }
  0x32   : > { %s2825_s14 = smul.u32 3, %s3545_s24  ;;  %s474_s9 = scalar_lea.vmem [#allocation7], %s2823_s15 }
  0x33   : > { %s481_s7 = sshll.u32 %s474_s9, 4  ;;  %s3576_s6 = scalar_lea.sflag [#allocation3], %s470_s18  ;;  %s3574_s7 = int_to_ptr.vmem [resolvable:$true] %s481_s7 }
  0x34   : > { %p3582_p5 = pneg %p3549_p0 }
  0x36   : > { %2858 = dma.hbm_to_vmem [thread:$0]  (!%p3538_p12), %s4133_s0, 512, %s444_s16, [#allocation3], %s4110_s26, %s4110_s26, %s4111_s27  }
  0x37   : > { %s3572_s11 = scalar_lea.hbm %s4134_s2, %s2824_s30  ;;  %s3119_s15 = scalar_lea.hbm %s4134_s2, 6144 }
  0x38   : > { %s3114_s5 = scalar_lea.hbm %s3572_s11, 3072  ;;  %p3120_p2 = scmp.lt.s32.totalorder %s3572_s11, %s4134_s2 }
  0x39   : > { %p3115_p4 = scmp.ne.s32.totalorder %s3572_s11, %s3114_s5  ;;  %p3121_p3 = scmp.lt.s32.totalorder %s3119_s15, %s3114_s5 }
  0x3b   : > { %p3117_p9 = pnand %p3582_p5, %p3115_p4  ;;  %p3122_p6 = por %p3121_p3, %p3120_p2 }
  0x3d   : > { %p3118_p13 = pneg %p3117_p9 }
  0x3f   : > { %p3123_p7 = pnand %p3122_p6, %p3118_p13 }
  0x41   : > { %3126 = shalt.err (!%p3123_p7)
}
  0x42   : > { %s3127_s16 = scalar_lea.vmem %s3574_s7, 3072  ;;  %s3383_s18 = smov [#allocation7]  }
  0x43   : > { %p3128_p11 = scmp.ne.s32.totalorder %s3574_s7, %s3127_s16  ;;  %s3132_s30 = sshll.u32 %s3383_s18, 4  ;;  %s3133_s30 = int_to_ptr.vmem [resolvable:$false] %s3132_s30 }
  0x44   : > { %s3134_s12 = scalar_lea.vmem %s3133_s30, 6144  ;;  %p3135_p1 = scmp.lt.s32.totalorder %s3574_s7, %s3133_s30 }
  0x45   : > { %p3130_p4 = pnand %p3128_p11, %p3582_p5  ;;  %p3136_p8 = scmp.lt.s32.totalorder %s3134_s12, %s3127_s16 }
  0x47   : > { %p3131_p9 = pneg %p3130_p4  ;;  %p3137_p10 = por %p3136_p8, %p3135_p1 }
  0x49   : > { %p3138_p12 = pnand %p3137_p10, %p3131_p9 }
  0x4b   : > { %3141 = shalt.err (!%p3138_p12)
}
  0x4c   : > { %s3384_s5 = smov 192   ;;  %s3385_s13 = smov 12  }
  0x4d   : > { %2865 = dma.hbm_to_vmem [thread:$0]  (!%p3549_p0), %s3572_s11, 3072, %s3574_s7, %s3576_s6, %s3384_s5, %s3384_s5, %s3385_s13  }
  0x4e   : > { %s2826_s15 = smul.u32 48, %s3378_s21  ;;  %s495_s9 = scalar_lea.vmem [#allocation8], %s2825_s14 }
  0x4f   : > { %s503_s23 = sshll.u32 %s495_s9, 4  ;;  %s2544_s16 = sshll.u32 %s3545_s24, 6  ;;  %s504_s23 = int_to_ptr.vmem [resolvable:$true] %s503_s23 }
  0x50   : > { %s4136_s3 = sld [smem:[#allocation26_spill]] }
  0x56   : > { %s501_s12 = scalar_lea.hbm %s4136_s3, %s2826_s15  ;;  %s3147_s2 = scalar_lea.hbm %s4136_s3, 96 }
  0x57   : > { %s3142_s26 = scalar_lea.hbm %s501_s12, 48  ;;  %p3148_p1 = scmp.lt.s32.totalorder %s501_s12, %s4136_s3 }
  0x58   : > { %p3143_p8 = scmp.ne.s32.totalorder %s501_s12, %s3142_s26  ;;  %p3149_p13 = scmp.lt.s32.totalorder %s3147_s2, %s3142_s26 }
  0x5a   : > { %p3145_p10 = pnand %p3143_p8, %p3582_p5  ;;  %p3150_p2 = por %p3149_p13, %p3148_p1 }
  0x5c   : > { %p3146_p12 = pneg %p3145_p10 }
  0x5e   : > { %p3151_p3 = pnand %p3150_p2, %p3146_p12 }
  0x60   : > { %3154 = shalt.err (!%p3151_p3)
}
  0x61   : > { %s3155_s14 = scalar_lea.vmem %s504_s23, 48  ;;  %s3386_s5 = smov [#allocation8]  }
  0x62   : > { %p3156_p6 = scmp.ne.s32.totalorder %s504_s23, %s3155_s14  ;;  %s3160_s13 = sshll.u32 %s3386_s5, 4  ;;  %s3161_s13 = int_to_ptr.vmem [resolvable:$false] %s3160_s13 }
  0x63   : > { %s3162_s15 = scalar_lea.vmem %s3161_s13, 96  ;;  %p3163_p4 = scmp.lt.s32.totalorder %s504_s23, %s3161_s13 }
  0x64   : > { %p3158_p7 = pnand %p3156_p6, %p3582_p5  ;;  %p3164_p9 = scmp.lt.s32.totalorder %s3162_s15, %s3155_s14 }
  0x66   : > { %p3159_p11 = pneg %p3158_p7  ;;  %p3165_p8 = por %p3164_p9, %p3163_p4 }
  0x68   : > { %p3166_p10 = pnand %p3165_p8, %p3159_p11 }
  0x6a   : > { %3169 = shalt.err (!%p3166_p10)
}
  0x6b   : > { %2868 = dma.hbm_to_vmem [thread:$0]  (!%p3549_p0), %s501_s12, 48, %s504_s23, %s3576_s6  }
  0x6c   : > { %s2672_s0 = sshll.u32 %s3378_s21, 10  ;;  %s514_s2 = scalar_lea.vmem [#allocation9], %s2544_s16 }
  0x6d   : > { %s521_s26 = sshll.u32 %s514_s2, 4  ;;  %s3629_s18 = scalar_lea.hbm %s4089_s4, %s2672_s0  ;;  %s3631_s26 = int_to_ptr.vmem [resolvable:$true] %s521_s26 }
  0x6e   : > { %s3170_s30 = scalar_lea.hbm %s3629_s18, 1024  ;;  %s3175_s16 = scalar_lea.hbm %s4089_s4, 2048 }
  0x6f   : > { %p3171_p12 = scmp.ne.s32.totalorder %s3629_s18, %s3170_s30  ;;  %p3176_p2 = scmp.lt.s32.totalorder %s3629_s18, %s4089_s4 }
  0x70   : > { %p3177_p3 = scmp.lt.s32.totalorder %s3175_s16, %s3170_s30 }
  0x71   : > { %p3173_p1 = pnand %p3171_p12, %p3582_p5 }
  0x72   : > { %p3178_p6 = por %p3177_p3, %p3176_p2 }
  0x73   : > { %p3174_p13 = pneg %p3173_p1 }
  0x75   : > { %p3179_p7 = pnand %p3178_p6, %p3174_p13 }
  0x77   : > { %3182 = shalt.err (!%p3179_p7)
}
  0x78   : > { %s3183_s14 = scalar_lea.vmem %s3631_s26, 1024  ;;  %s3387_s5 = smov [#allocation9]  }
  0x79   : > { %p3184_p11 = scmp.ne.s32.totalorder %s3631_s26, %s3183_s14  ;;  %s3188_s13 = sshll.u32 %s3387_s5, 4  ;;  %s3189_s13 = int_to_ptr.vmem [resolvable:$false] %s3188_s13 }
  0x7a   : > { %s3190_s15 = scalar_lea.vmem %s3189_s13, 2048  ;;  %p3191_p8 = scmp.lt.s32.totalorder %s3631_s26, %s3189_s13 }
  0x7b   : > { %p3186_p4 = pnand %p3184_p11, %p3582_p5  ;;  %p3192_p10 = scmp.lt.s32.totalorder %s3190_s15, %s3183_s14 }
  0x7d   : > { %p3187_p9 = pneg %p3186_p4  ;;  %p3193_p12 = por %p3192_p10, %p3191_p8 }
  0x7f   : > { %p3194_p1 = pnand %p3193_p12, %p3187_p9 }
  0x81   : > { %3197 = shalt.err (!%p3194_p1)
}
  0x82   : > { %s3388_s0 = smov 64   ;;  %s3389_s2 = smov 4  }
  0x83   : > { %2871 = dma.hbm_to_vmem [thread:$0]  (!%p3549_p0), %s3629_s18, 1024, %s3631_s26, %s3576_s6, %s3388_s0, %s3388_s0, %s3389_s2  }
  0x84   : > { %s2547_s27 = sshll.u32 %s3545_s24, 8  ;;  %s2673_s9 = sshll.u32 %s3378_s21, 12 }
  0x85   : > { %s3664_s23 = scalar_lea.hbm %s4093_s8, %s2673_s9  ;;  %s553_s16 = scalar_lea.vmem [#allocation10], %s2547_s27 }
  0x86   : > { %s560_s12 = sshll.u32 %s553_s16, 4  ;;  %s3198_s11 = scalar_lea.hbm %s3664_s23, 4096  ;;  %s3668_s12 = int_to_ptr.vmem [resolvable:$true] %s560_s12 }
  0x87   : > { %p3199_p13 = scmp.ne.s32.totalorder %s3664_s23, %s3198_s11  ;;  %s3203_s14 = scalar_lea.hbm %s4093_s8, 8192 }
  0x88   : > { %p3204_p6 = scmp.lt.s32.totalorder %s3664_s23, %s4093_s8  ;;  %p3205_p7 = scmp.lt.s32.totalorder %s3203_s14, %s3198_s11 }
  0x89   : > { %p3201_p2 = pnand %p3199_p13, %p3582_p5 }
  0x8a   : > { %p3206_p11 = por %p3205_p7, %p3204_p6 }
  0x8b   : > { %p3202_p3 = pneg %p3201_p2 }
  0x8d   : > { %p3207_p4 = pnand %p3206_p11, %p3202_p3 }
  0x8f   : > { %3210 = shalt.err (!%p3207_p4)
}
  0x90   : > { %s3211_s15 = scalar_lea.vmem %s3668_s12, 4096  ;;  %s3390_s30 = smov [#allocation10]  }
  0x91   : > { %p3212_p9 = scmp.ne.s32.totalorder %s3668_s12, %s3211_s15  ;;  %s3216_s7 = sshll.u32 %s3390_s30, 4  ;;  %s3217_s7 = int_to_ptr.vmem [resolvable:$false] %s3216_s7 }
  0x92   : > { %s3218_s16 = scalar_lea.vmem %s3217_s7, 8192  ;;  %p3219_p12 = scmp.lt.s32.totalorder %s3668_s12, %s3217_s7 }
  0x93   : > { %p3214_p8 = pnand %p3212_p9, %p3582_p5  ;;  %p3220_p1 = scmp.lt.s32.totalorder %s3218_s16, %s3211_s15 }
  0x95   : > { %p3215_p10 = pneg %p3214_p8  ;;  %p3221_p13 = por %p3220_p1, %p3219_p12 }
  0x97   : > { %p3222_p2 = pnand %p3221_p13, %p3215_p10 }
  0x99   : > { %3225 = shalt.err (!%p3222_p2)
}
  0x9a   : > { %s3391_s11 = smov 256   ;;  %s3392_s26 = smov 16  }
  0x9b   : > { %2874 = dma.hbm_to_vmem [thread:$0]  (!%p3549_p0), %s3664_s23, 4096, %s3668_s12, %s3576_s6, %s3391_s11, %s3391_s11, %s3392_s26  }
  0x9c   : > { %s3393_s18 = smov [#allocation5]   ;;  %s3696_s15 = scalar_lea.hbm %s4095_s10, %s2673_s9 }
  0x9d   : > { %s456_s14 = sshll.u32 %s3393_s18, 4  ;;  %s581_s30 = scalar_lea.vmem [#allocation11], %s2547_s27  ;;  %s457_s14 = int_to_ptr.vmem [resolvable:$true] %s456_s14 }
  0x9e   : > { %s588_s7 = sshll.u32 %s581_s30, 4  ;;  %s3237_s16 = scalar_lea.vmem %s457_s14, 512  ;;  %s589_s7 = int_to_ptr.vmem [resolvable:$true] %s588_s7 }
  0x9f   : > { %p3238_p3 = scmp.ne.s32.totalorder %s457_s14, %s3237_s16  ;;  %p4137_p6 = scmp.ne.s32.totalorder %s4131_s17, 0 }
  0xa0   : > { %p3245_p9 = scmp.lt.s32.totalorder %s457_s14, %s457_s14  ;;  %p3246_p8 = scmp.lt.s32.totalorder %s3237_s16, %s3237_s16 }
  0xa1   : > { %p4138_p7 = pneg %p4137_p6 }
  0xa2   : > { %p3247_p10 = por %p3246_p8, %p3245_p9 }
  0xa3   : > { %p3240_p11 = pnand %p3238_p3, %p4138_p7 }
  0xa5   : > { %p3241_p4 = pneg %p3240_p11 }
  0xa7   : > { %p3248_p12 = pnand %p3247_p10, %p3241_p4 }
  0xa9   : > { %3251 = shalt.err (!%p3248_p12)
}
  0xaa   : > { %s4139_s21 = smov 8   ;;  %s4140_s9 = smov 128  }
  0xab   : > { %s4141_s1 = sld [smem:[#allocation24_spill]]  ;;  %s3252_s27 = scalar_lea.hbm %s3696_s15, 4096 }
  0xac   : > { %p3253_p1 = scmp.ne.s32.totalorder %s3696_s15, %s3252_s27  ;;  %s3257_s17 = scalar_lea.hbm %s4095_s10, 8192 }
  0xad   : > { %p3258_p3 = scmp.lt.s32.totalorder %s3696_s15, %s4095_s10  ;;  %p3259_p7 = scmp.lt.s32.totalorder %s3257_s17, %s3252_s27 }
  0xae   : > { %p3255_p13 = pnand %p3253_p1, %p3582_p5 }
  0xaf   : > { %p3260_p11 = por %p3259_p7, %p3258_p3 }
  0xb0   : > { %p3256_p2 = pneg %p3255_p13 }
  0xb1   : > { %2861 = dma.hbm_to_vmem [thread:$0]  (!%p4137_p6), %s4141_s1, 512, %s457_s14, [#allocation6], %s4140_s9, %s4140_s9, %s4139_s21  }
  0xb2   : > { %p3261_p4 = pnand %p3260_p11, %p3256_p2 }
  0xb4   : > { %3264 = shalt.err (!%p3261_p4)
}
  0xb5   : > { %s3265_s5 = scalar_lea.vmem %s589_s7, 4096  ;;  %s3394_s14 = smov [#allocation11]  }
  0xb6   : > { %p3266_p6 = scmp.ne.s32.totalorder %s589_s7, %s3265_s5  ;;  %s3270_s13 = sshll.u32 %s3394_s14, 4  ;;  %s3271_s13 = int_to_ptr.vmem [resolvable:$false] %s3270_s13 }
  0xb7   : > { %s3272_s30 = scalar_lea.vmem %s3271_s13, 8192  ;;  %p3273_p10 = scmp.lt.s32.totalorder %s589_s7, %s3271_s13 }
  0xb8   : > { %p3268_p9 = pnand %p3266_p6, %p3582_p5  ;;  %p3274_p12 = scmp.lt.s32.totalorder %s3272_s30, %s3265_s5 }
  0xba   : > { %p3269_p8 = pneg %p3268_p9  ;;  %p3275_p1 = por %p3274_p12, %p3273_p10 }
  0xbc   : > { %p3276_p13 = pnand %p3275_p1, %p3269_p8 }
  0xbe   : > { %3279 = shalt.err (!%p3276_p13)
}
  0xbf   : > { %2877 = dma.hbm_to_vmem [thread:$0]  (!%p3549_p0), %s3696_s15, 4096, %s589_s7, %s3576_s6, %s3388_s0, %s3388_s0, %s3389_s2  }
  0xc0   : > { %p4142_p5 = scmp.ne.s32.totalorder %s4130_s29, 0 }
  0xc1   : > { %p4143_p2 = scmp.eq.s32.totalorder (!%p4142_p5), %s3501_s22, 0 }
  0xc2   : > { %618 = sbr.rel (%p4142_p5) target bundleno = 2467 (0x9a3), region = 76 }
  0xc7   : > { %3345 = dma.done.wait (%p4143_p2), [#allocation3], 512   ;;  %p4144_p3 = pmov %p4143_p2 }
  0xc8   : > { %p4145_p7 = pmov %p4143_p2 }
  0xc9   : > { %3347 = vsyncadd (%p4144_p3), [#allocation3], 4294966784 }
  0xca   : > { %3349 = dma.done.wait (%p4145_p7), [#allocation6], 512   ;;  %p4146_p11 = pmov %p4143_p2 }
  0xcb   : > { %s628_s25 = sand.u32 1, %s3501_s22   ;;  %s630_s6 = sand.u32 1, %s3370_s19  }
  0xcc   : > { %3351 = vsyncadd (%p4146_p11), [#allocation6], 4294966784  ;;  %s2827_s20 = smul.u32 192, %s630_s6  ;;  %s629_s29 = scalar_lea.sflag [#allocation3], %s628_s25 }
  0xcd   : > { %p4147_p0 = scmp.ne.s32.totalorder %s4129_s28, 0 }
  0xce   : > { %s3743_s0 = scalar_lea.vmem [#allocation7], %s2827_s20 }
  0xcf   : > { %3353 = dma.done.wait (%p4147_p0), %s629_s29, 12336  }
  0xd0   : > { %3355 = vsyncadd (%p4147_p0), %s629_s29, 4294954960  ;;  %s2828_s2 = smul.u32 3, %s630_s6  ;;  %s2556_s15 = sshll.u32 %s630_s6, 6 }
  0xd1   : > { %s2557_s7 = sshll.u32 %s630_s6, 8  ;;  %p752_p4 = scmp.lt.s32.totalorder %s3501_s22, 1 }
  0xd2   : > { %s4150_s18 = sld [smem:[#allocation29_spill]]  ;;  %s3783_s17 = scalar_lea.vmem [#allocation8], %s2828_s2 }
  0xd3   : > { %s3751_s16 = scalar_select %p752_p4, %s3501_s22, 1 }
  0xd4   : > { %s4151_s25 = sld [smem:[#allocation30_spill]]  ;;  %s3785_s26 = scalar_lea.vmem [#allocation9], %s2556_s15 }
  0xd5   : > { %s2559_s14 = sshll.u32 %s3751_s16, 2  ;;  %s4152_s21 = sld [smem:[#allocation31_spill]] }
  0xd6   : > { %s4153_s28 = sld [smem:[#allocation32_spill]]  ;;  %p4155_p6 = scmp.ne.s32.totalorder %s3501_s22, 0 }
  0xd7   : > { %s4154_s12 = sld [smem:[#allocation33_spill]] }
  0xd8   : > { %s760_s5 = scalar_lea.vmem %s4150_s18, %s3751_s16  ;;  %s3787_s18 = scalar_lea.vmem [#allocation10], %s2557_s7 }
  0xd9   : > { %778 = sbr.rel (%p4155_p6) target bundleno = 225 (0xe1), region = 108 }
  0xda   : > { %s3769_s6 = scalar_lea.vmem %s4151_s25, %s2559_s14  ;;  %s3789_s14 = scalar_lea.vmem [#allocation11], %s2557_s7 }
  0xdb   : > { %s767_s9 = scalar_lea.vmem %s4152_s21, %s3751_s16 }
  0xdc   : > { %s770_s3 = scalar_lea.vmem %s4153_s28, %s3751_s16 }
  0xdd   : > { %s773_s11 = scalar_lea.vmem %s4154_s12, %s3751_s16 }
  0xde   : > { %v779_v0 = vld [vmem:[#allocation2] sm:$0xff]  ;;  %v780_v1 = vld [vmem:[#allocation2 + $0x8] sm:$0xff]  ;;  %v781_v2 = vld [vmem:[#allocation2 + $0x10] sm:$0xff] }
  0xdf   : > { %783 = vst [vmem:[#allocation12] sm:$0xff] %v779_v0  ;;  %784 = vst [vmem:[#allocation12 + $0x8] sm:$0xff] %v780_v1  ;;  %v782_v3 = vld [vmem:[#allocation2 + $0x18] sm:$0xff] }
  0xe0   : > { %785 = vst [vmem:[#allocation12 + $0x10] sm:$0xff] %v781_v2  ;;  %786 = vst [vmem:[#allocation12 + $0x18] sm:$0xff] %v782_v3 }
  0xe1 PF: > { %v2936_v4 = vld [vmem:[%s3743_s0 + $0xac] ss:$12 sps:$4 sm:$0xff]   ;;  %v2938_v5 = vld [vmem:[%s3743_s0 + $0xa8] ss:$12 sps:$4 sm:$0xff]   ;;  %v3395_v6 = vmov 0   ;;  %v3396_v27 = vmov 0.0   ;;  %v827_v28 = vlaneseq }
  0xe2   : > { %1002 = vmatprep.mubr.bf16.mxu0 %v3395_v6  ;;  %970 = vmatprep.subr.bf16.mxu0 %v2936_v4  ;;  %v2939_v7 = vld [vmem:[%s3743_s0 + $0x94] ss:$12 sps:$4 sm:$0xff]   ;;  %v2941_v8 = vld [vmem:[%s3743_s0 + $0x90] ss:$12 sps:$4 sm:$0xff]   ;;  %v2944_v10 = vld [vmem:[%s3743_s0 + $0x78] ss:$12 sps:$4 sm:$0xff]  }
  0xe3   : > { %971 = vmatpush1.bf16.msra.mxu0 %v2938_v5  ;;  %v2942_v9 = vld [vmem:[%s3743_s0 + $0x7c] ss:$12 sps:$4 sm:$0xff]   ;;  %v2945_v11 = vld [vmem:[%s3743_s0 + $0x64] ss:$12 sps:$4 sm:$0xff]   ;;  %v2947_v13 = vld [vmem:[%s3743_s0 + $0x60] ss:$12 sps:$4 sm:$0xff]  }
  0xe4   : > { %972 = vmatprep.subr.bf16.mxu0 %v2939_v7  ;;  %v2948_v15 = vld [vmem:[%s3743_s0 + $0x4c] ss:$12 sps:$4 sm:$0xff]   ;;  %v2950_v17 = vld [vmem:[%s3743_s0 + $0x48] ss:$12 sps:$4 sm:$0xff]   ;;  %v2953_v19 = vld [vmem:[%s3743_s0 + $0x30] ss:$12 sps:$4 sm:$0xff]  }
  0xe5   : > { %v2951_v18 = vld [vmem:[%s3743_s0 + $0x34] ss:$12 sps:$4 sm:$0xff]   ;;  %v2954_v20 = vld [vmem:[%s3743_s0 + $0x1c] ss:$12 sps:$4 sm:$0xff]   ;;  %v2956_v21 = vld [vmem:[%s3743_s0 + $0x18] ss:$12 sps:$4 sm:$0xff]  }
  0xe6   : > { %v3801_v12 = vld [vmem:[#allocation12] sm:$0xff]  ;;  %v3804_v14 = vld [vmem:[#allocation12 + $0x8] sm:$0xff]  ;;  %vm3397_vm0 = vmmov 0   ;;  %v3829_v29 = vshrl.u32 %v827_v28, 7  ;;  %v3833_v32 = vld [vmem:[%s3783_s17] sm:$0x7] }
  0xe7   : > { %973 = vmatpush1.bf16.msra.mxu0 %v2941_v8  ;;  %v791_v16 = vpack.c.bf16 %v3804_v14, %v3801_v12  ;;  %v2957_v22 = vld [vmem:[%s3743_s0 + $0x4] ss:$12 sps:$4 sm:$0xff]   ;;  %v2959_v23 = vld [vmem:[%s3743_s0] ss:$12 sps:$4 sm:$0xff]   ;;  %v3816_v24 = vld [vmem:[#allocation12 + $0x10] sm:$0xff]  ;;  %vm1172_vm1 = vcmask 130048  }
  0xe8   : > { %974 = vmatprep.subr.bf16.mxu0 %v2942_v9  ;;  %v3818_v25 = vld [vmem:[#allocation12 + $0x18] sm:$0xff]  ;;  %v833_v30 = vsub.s32 1, %v3829_v29  ;;  %v829_v36 = vsub.s32 0, %v3829_v29  ;;  %v2963_v58 = vld [vmem:[%s3743_s0 + $0x68] ss:$12 sps:$4 sm:$0xff]   ;;  %s4156_s2 = sld [smem:[#allocation27_spill]] }
  0xe9   : > { %2775 = vmatprep.mubr.bf16.mxu1 %v791_v16  ;;  %v3823_v26 = vpack.c.bf16 %v3818_v25, %v3816_v24  ;;  %v2960_v55 = vld [vmem:[%s3743_s0 + $0xb0] ss:$12 sps:$4 sm:$0xff]   ;;  %v2961_v56 = vld [vmem:[%s3743_s0 + $0x98] ss:$12 sps:$4 sm:$0xff]   ;;  %v2962_v57 = vld [vmem:[%s3743_s0 + $0x80] ss:$12 sps:$4 sm:$0xff]  }
  0xea   : > { %v834_v34 = vrot.slane %v3833_v32, %v833_v30  ;;  %v830_v42 = vrot.slane %v3833_v32, %v829_v36  ;;  %2759 = vmatprep.subr.bf16.mxu1 %v2960_v55  ;;  %v2964_v59 = vld [vmem:[%s3743_s0 + $0x50] ss:$12 sps:$4 sm:$0xff]   ;;  %v2965_v60 = vld [vmem:[%s3743_s0 + $0x38] ss:$12 sps:$4 sm:$0xff]   ;;  %v2966_v61 = vld [vmem:[%s3743_s0 + $0x20] ss:$12 sps:$4 sm:$0xff]  }
  0xeb   : > { %975 = vmatpush1.bf16.msra.mxu0 %v2944_v10  ;;  %2760 = vmatpush3.bf16.msra.mxu1 %v2960_v55  ;;  %v2967_v62 = vld [vmem:[%s3743_s0 + $0x8] ss:$12 sps:$4 sm:$0xff]   ;;  %v1164_v0 = vld [vmem:[#allocation5] sm:$0xff]  ;;  %s4158_s13 = sld [smem:[#allocation28_spill]]  ;;  %p2665_p9 = scmp.ne.s32.totalorder %s3501_s22, 1 }
  0xec   : > { %976 = vmatprep.subr.bf16.mxu0 %v2945_v11  ;;  %2761 = vmatprep.subr.bf16.mxu1 %v2961_v56  ;;  %v1165_v5 = vld [vmem:[#allocation5 + $0x8] sm:$0xff] }
  0xee   : > { %s4157_s15 = scalar_lea.vmem %s4156_s2, %s3751_s16 }
  0xef   : > { %977 = vmatpush1.bf16.msra.mxu0 %v2947_v13  ;;  %2762 = vmatpush3.bf16.msra.mxu1 %v2961_v56  ;;  %v1166_v13 = vld [vmem:[#allocation5 + $0x10] sm:$0xff] }
  0xf0   : > { %978 = vmatprep.subr.bf16.mxu0 %v2948_v15  ;;  %2763 = vmatprep.subr.bf16.mxu1 %v2962_v57 }
  0xf1   : > { %s4159_s30 = scalar_lea.vmem %s4158_s13, %s3751_s16 }
  0xf3   : > { %979 = vmatpush1.bf16.msra.mxu0 %v2950_v17  ;;  %2764 = vmatpush3.bf16.msra.mxu1 %v2962_v57 }
  0xf4   : > { %980 = vmatprep.subr.bf16.mxu0 %v2951_v18  ;;  %2765 = vmatprep.subr.bf16.mxu1 %v2963_v58 }
  0xf7   : > { %981 = vmatpush1.bf16.msra.mxu0 %v2953_v19  ;;  %2766 = vmatpush3.bf16.msra.mxu1 %v2963_v58 }
  0xf8   : > { %982 = vmatprep.subr.bf16.mxu0 %v2954_v20  ;;  %2767 = vmatprep.subr.bf16.mxu1 %v2964_v59  ;;  %v1167_v20 = vld [vmem:[#allocation5 + $0x18] sm:$0xff] }
  0xfb   : > { %983 = vmatpush1.bf16.msra.mxu0 %v2956_v21  ;;  %2768 = vmatpush3.bf16.msra.mxu1 %v2964_v59 }
  0xfc   : > { %984 = vmatprep.subr.bf16.mxu0 %v2957_v22  ;;  %2769 = vmatprep.subr.bf16.mxu1 %v2965_v60 }
  0xff   : > { %985 = vmatpush1.bf16.msra.mxu0 %v2959_v23  ;;  %2770 = vmatpush3.bf16.msra.mxu1 %v2965_v60 }
 0x100   : > { %2779 = vmatprep.subr.bf16.mxu0 %v3396_v27  ;;  %2771 = vmatprep.subr.bf16.mxu1 %v2966_v61 }
 0x102   : > { %1003 = vmatmul.mubr.bf16.vlgmr.msra.gmra.mxu0 %v791_v16 }
 0x103   : > { %1012 = vmatprep.mubr.bf16.mxu0 %v3395_v6  ;;  %2772 = vmatpush3.bf16.msra.mxu1 %v2966_v61 }
 0x104   : > { %2773 = vmatprep.subr.bf16.mxu1 %v2967_v62 }
 0x107   : > { %2774 = vmatpush3.bf16.msra.mxu1 %v2967_v62 }
 0x108   : > { %2791 = vmatprep.subr.bf16.mxu1 %v3396_v27 }
 0x10a   : > { %1013 = vmatmul.mubr.bf16.gmra.mxu0 %v3823_v26  ;;  %2776 = vmatmul.mubr.bf16.vlgmr.msra.gmra.mxu1 %v3823_v26 }
 0x10b   : > { %2781 = vmatprep.mubr.msk.bf16.mxu0 %vm3397_vm0, %v3396_v27  ;;  %2793 = vmatprep.mubr.msk.bf16.mxu1 %vm3397_vm0, %v3396_v27 }
 0x1c2   : > { %v1004_v31 = vpop.f32.mrf.mxu0 }
 0x1c3   : > { %v1005_v46 = vadd.f32 %v1004_v31, %v830_v42 }
 0x1c4   : > { %v1006_v33 = vpop.f32.mrf.mxu0 }
 0x1c5   : > { %v1007_v38 = vadd.f32 %v1006_v33, %v834_v34 }
 0x1c6   : > { %v1008_v35 = vpop.f32.mrf.mxu0 }
 0x1c7   : > { %v1009_v44 = vadd.f32 %v1008_v35, %v830_v42 }
 0x1c8   : > { %v1010_v37 = vpop.f32.mrf.mxu0 }
 0x1c9   : > { %v1011_v39 = vadd.f32 %v1010_v37, %v834_v34  ;;  %v1072_v50 = vpack.c.bf16 %v1009_v44, %v1005_v46 }
 0x1ca   : > { %v1014_v40 = vpop.f32.mrf.mxu0 }
 0x1cb   : > { %v1074_v41 = vpack.c.bf16 %v1011_v39, %v1007_v38  ;;  %v1015_v53 = vadd.f32 %v1014_v40, %v830_v42 }
 0x1cc   : > { %v1016_v43 = vpop.f32.mrf.mxu0 }
 0x1cd   : > { %2780 = vmatpush3.bf16.xpose.msra.mxu0 %v1074_v41  ;;  %v1017_v48 = vadd.f32 %v1016_v43, %v834_v34 }
 0x1ce   : > { %v1018_v45 = vpop.f32.mrf.mxu0  ;;  %2785 = vmatprep.subr.bf16.mxu0 %v3396_v27 }
 0x1cf   : > { %v1019_v52 = vadd.f32 %v1018_v45, %v830_v42 }
 0x1d0   : > { %v1020_v47 = vpop.f32.mrf.mxu0 }
 0x1d1   : > { %v1021_v49 = vadd.f32 %v1020_v47, %v834_v34  ;;  %v1073_v54 = vpack.c.bf16 %v1019_v52, %v1015_v53  ;;  %v837_v52 = vsub.s32 2, %v3829_v29  ;;  %v2777_v53 = vpop.f32.mrf.mxu1 }
 0x1d3   : > { %v1075_v51 = vpack.c.bf16 %v1021_v49, %v1017_v48  ;;  %v1057_v55 = vpop.f32.mrf.mxu1 }
 0x1d4   : > { %2782 = vmatmul.mubr.bf16.vlgmr.msra.gmra.mxu0 %v1072_v50 }
 0x1d5   : > { %2786 = vmatpush3.bf16.xpose.msra.mxu0 %v1075_v51  ;;  %2787 = vmatprep.mubr.msk.bf16.mxu0 %vm3397_vm0, %v3396_v27  ;;  %v2778_v57 = vpop.f32.mrf.mxu1 }
 0x1d6   : > { %2797 = vmatprep.subr.bf16.mxu0 %v3396_v27 }
 0x1d7   : > { %v1060_v60 = vpop.f32.mrf.mxu1 }
 0x1dc   : > { %2788 = vmatmul.mubr.bf16.vlgmr.msra.gmra.mxu0 %v1073_v54  ;;  %v838_v54 = vrot.slane %v3833_v32, %v837_v52 }
 0x1dd   : > { %2799 = vmatprep.mubr.msk.bf16.mxu0 %vm3397_vm0, %v3396_v27 }
 0x1de   : > { %v1066_v56 = vadd.f32 %v2777_v53, %v838_v54  ;;  %v1058_v58 = vadd.f32 %v1057_v55, %v838_v54  ;;  %v1069_v59 = vadd.f32 %v2778_v57, %v838_v54  ;;  %v1061_v62 = vadd.f32 %v1060_v60, %v838_v54  ;;  %v2976_v54 = vld [vmem:[%s3787_s18 + $0xe0] ss:$16 sps:$4 sm:$0xff]   ;;  %v2978_v55 = vld [vmem:[%s3787_s18 + $0xe4] ss:$16 sps:$4 sm:$0xff]   ;;  %v2981_v57 = vld [vmem:[%s3787_s18 + $0xec] ss:$16 sps:$4 sm:$0xff]  }
 0x1e0   : > { %v1077_v61 = vpack.c.bf16 %v1069_v59, %v1066_v56  ;;  %v2979_v56 = vld [vmem:[%s3787_s18 + $0xe8] ss:$16 sps:$4 sm:$0xff]  }
 0x1e2   : > { %2798 = vmatpush3.bf16.msra.mxu0 %v1077_v61 }
 0x1e3   : > { %1716 = vmatprep.subr.bf16.mxu0 %v2978_v55 }
 0x294   : > { %v1112_v63 = vpop.f32.mrf.mxu0 }
 0x295   : > { %v1160_v1 = vmul.f32 0.088388346, %v1112_v63  ;;  %v1076_v63 = vpack.c.bf16 %v1061_v62, %v1058_v58 }
 0x296   : > { %v2783_v2 = vpop.f32.mrf.mxu0 }
 0x297   : > { %v1168_v3 = vadd.f32 %v1164_v0, %v1160_v1  ;;  %2792 = vmatpush3.bf16.msra.mxu1 %v1076_v63  ;;  %v2968_v0 = vld [vmem:[%s3785_s26 + $0x38] sm:$0xff]  }
 0x298   : > { %v1115_v4 = vpop.f32.mrf.mxu0  ;;  %2803 = vmatprep.subr.bf16.mxu1 %v2968_v0 }
 0x299   : > { %v1161_v7 = vmul.f32 0.088388346, %v1115_v4  ;;  %v1173_v8 = vsel %vm1172_vm1, %v1168_v3, -inf }
 0x29a   : > { %1174 = vmax.xlane.f32.xlu0 %v1173_v8  ;;  %v2784_v9 = vpop.f32.mrf.mxu0 }
 0x29b   : > { %v1169_v10 = vadd.f32 %v1165_v5, %v1161_v7 }
 0x29c   : > { %v1153_v11 = vpop.f32.mrf.mxu0 }
 0x29d   : > { %v1162_v15 = vmul.f32 0.088388346, %v1153_v11  ;;  %v1176_v16 = vsel %vm1172_vm1, %v1169_v10, -inf }
 0x29e   : > { %1177 = vmax.xlane.f32.xlu0 %v1176_v16  ;;  %v2789_v17 = vpop.f32.mrf.mxu0 }
 0x29f   : > { %v1170_v18 = vadd.f32 %v1166_v13, %v1162_v15  ;;  %v2970_v13 = vld [vmem:[%s3785_s26 + $0x28] sm:$0xff]  }
 0x2a0   : > { %v1156_v19 = vpop.f32.mrf.mxu0 }
 0x2a1   : > { %v1163_v21 = vmul.f32 0.088388346, %v1156_v19  ;;  %v1179_v22 = vsel %vm1172_vm1, %v1170_v18, -inf  ;;  %v2971_v19 = vld [vmem:[%s3785_s26 + $0x20] sm:$0xff]  }
 0x2a2   : > { %1180 = vmax.xlane.f32.xlu1 %v1179_v22  ;;  %v2790_v23 = vpop.f32.mrf.mxu0  ;;  %v2974_v22 = vld [vmem:[%s3785_s26 + $0x8] sm:$0xff]  }
 0x2a3   : > { %v1171_v26 = vadd.f32 %v1167_v20, %v1163_v21  ;;  %v2972_v20 = vld [vmem:[%s3785_s26 + $0x18] sm:$0xff]   ;;  %v2973_v21 = vld [vmem:[%s3785_s26 + $0x10] sm:$0xff]   ;;  %v2975_v23 = vld [vmem:[%s3785_s26] sm:$0xff]  }
 0x2a5   : > { %v1182_v27 = vsel %vm1172_vm1, %v1171_v26, -inf }
 0x2a6   : > { %1183 = vmax.xlane.f32.xlu1 %v1182_v27 }
 0x323   : > { %v1175_v28 = vpop.xlane.xlu0 %1174 }
 0x324   : > { %v1185_v31 = vsub.f32 %v1168_v3, %v1175_v28 }
 0x326   : > { %v1189_v33 = vmul.f32 1.442695, %v1185_v31 }
 0x327   : > { %v1178_v34 = vpop.xlane.xlu0 %1177 }
 0x328   : > { %3056 = vpow2.f32 %v1189_v33  ;;  %v1186_v35 = vsub.f32 %v1169_v10, %v1178_v34  ;;  %v2969_v10 = vld [vmem:[%s3785_s26 + $0x30] sm:$0xff]  }
 0x32a   : > { %v1191_v37 = vmul.f32 1.442695, %v1186_v35 }
 0x32b   : > { %v1181_v38 = vpop.xlane.xlu1 %1180 }
 0x32c   : > { %3058 = vpow2.f32 %v1191_v37  ;;  %v1187_v39 = vsub.f32 %v1170_v18, %v1181_v38 }
 0x32e   : > { %v1193_v40 = vmul.f32 1.442695, %v1187_v39 }
 0x32f   : > { %v1184_v41 = vpop.xlane.xlu1 %1183 }
 0x330   : > { %3060 = vpow2.f32 %v1193_v40  ;;  %v1188_v42 = vsub.f32 %v1171_v26, %v1184_v41  ;;  %v2587_v41 = vld [vmem:[%s4157_s15] ss:$0 sm:$0xff] }
 0x332   : > { %v1195_v43 = vmul.f32 1.442695, %v1188_v42 }
 0x334   : > { %3062 = vpow2.f32 %v1195_v43 }
 0x335   : > { %v3057_v44 = vpop.eup %3056 }
 0x336   : > { %v1197_v45 = vsel %vm1172_vm1, %v3057_v44, 0.0 }
 0x337   : > { %1198 = vadd.xlane.f32.xlu0 %v1197_v45 }
 0x339   : > { %v3059_v46 = vpop.eup %3058 }
 0x33a   : > { %v1200_v47 = vsel %vm1172_vm1, %v3059_v46, 0.0 }
 0x33b   : > { %1201 = vadd.xlane.f32.xlu1 %v1200_v47 }
 0x33d   : > { %v3061_v48 = vpop.eup %3060 }
 0x33e   : > { %v1203_v49 = vsel %vm1172_vm1, %v3061_v48, 0.0 }
 0x33f   : > { %1204 = vadd.xlane.f32.xlu0 %v1203_v49 }
 0x341   : > { %v3063_v50 = vpop.eup %3062 }
 0x342   : > { %v1206_v51 = vsel %vm1172_vm1, %v3063_v50, 0.0 }
 0x343   : > { %1207 = vadd.xlane.f32.xlu1 %v1206_v51 }
 0x3c0   : > { %v1199_v1 = vpop.xlane.xlu0 %1198 }
 0x3c1   : > { %3064 = vrcp.f32 %v1199_v1 }
 0x3c4   : > { %v1202_v2 = vpop.xlane.xlu1 %1201 }
 0x3c5   : > { %3066 = vrcp.f32 %v1202_v2 }
 0x3c8   : > { %v1205_v32 = vpop.xlane.xlu0 %1204 }
 0x3c9   : > { %3068 = vrcp.f32 %v1205_v32 }
 0x3cc   : > { %v1208_v3 = vpop.xlane.xlu1 %1207 }
 0x3cd   : > { %3070 = vrcp.f32 %v1208_v3 }
 0x3ce   : > { %v3065_v4 = vpop.eup %3064 }
 0x3cf   : > { %v3873_v7 = vmul.f32 %v3065_v4, %v3057_v44 }
 0x3d2   : > { %v3067_v5 = vpop.eup %3066 }
 0x3d3   : > { %v3875_v8 = vmul.f32 %v3067_v5, %v3059_v46  ;;  %v2984_v5 = vld [vmem:[%s3787_s18 + $0xc4] ss:$16 sps:$4 sm:$0xff]  }
 0x3d5   : > { %v1217_v9 = vpack.c.bf16 %v3875_v8, %v3873_v7 }
 0x3d6   : > { %v3069_v11 = vpop.eup %3068 }
 0x3d7   : > { %2794 = vmatmul.mubr.msk.bf16.vlgmr.msra.gmra.mxu1 %vm1172_vm1, %v1217_v9  ;;  %v3882_v16 = vmul.f32 %v3069_v11, %v3061_v48  ;;  %v2987_v9 = vld [vmem:[%s3787_s18 + $0xcc] ss:$16 sps:$4 sm:$0xff]   ;;  %v2985_v11 = vld [vmem:[%s3787_s18 + $0xc8] ss:$16 sps:$4 sm:$0xff]  }
 0x3d8   : > { %2804 = vmatpush3.bf16.msra.mxu1 %v2968_v0 }
 0x3d9   : > { %2805 = vmatprep.subr.bf16.mxu1 %v2969_v10 }
 0x3da   : > { %v3071_v15 = vpop.eup %3070 }
 0x3db   : > { %v3884_v17 = vmul.f32 %v3071_v15, %v3063_v50  ;;  %v2993_v15 = vld [vmem:[%s3787_s18 + $0xac] ss:$16 sps:$4 sm:$0xff]  }
 0x3dc   : > { %2806 = vmatpush3.bf16.msra.mxu1 %v2969_v10  ;;  %v2982_v10 = vld [vmem:[%s3787_s18 + $0xc0] ss:$16 sps:$4 sm:$0xff]  }
 0x3dd   : > { %v1218_v18 = vpack.c.bf16 %v3884_v17, %v3882_v16  ;;  %2807 = vmatprep.subr.bf16.mxu1 %v2970_v13 }
 0x3df   : > { %2800 = vmatmul.mubr.msk.bf16.vlgmr.msra.gmra.mxu0 %vm1172_vm1, %v1218_v18  ;;  %v2988_v18 = vld [vmem:[%s3787_s18 + $0xa0] ss:$16 sps:$4 sm:$0xff]  }
 0x3e0   : > { %2808 = vmatpush3.bf16.msra.mxu1 %v2970_v13  ;;  %1748 = vmatprep.mubr.bf16.mxu0 %v3395_v6  ;;  %v2990_v13 = vld [vmem:[%s3787_s18 + $0xa4] ss:$16 sps:$4 sm:$0xff]  }
 0x3e1   : > { %2809 = vmatprep.subr.bf16.mxu1 %v2971_v19  ;;  %1717 = vmatpush1.bf16.msra.mxu0 %v2976_v54 }
 0x3e2   : > { %1718 = vmatprep.subr.bf16.mxu0 %v2984_v5 }
 0x3e4   : > { %2810 = vmatpush3.bf16.msra.mxu1 %v2971_v19  ;;  %v2991_v19 = vld [vmem:[%s3787_s18 + $0xa8] ss:$16 sps:$4 sm:$0xff]  }
 0x3e5   : > { %2811 = vmatprep.subr.bf16.mxu1 %v2972_v20  ;;  %1719 = vmatpush1.bf16.msra.mxu0 %v2982_v10 }
 0x3e6   : > { %1720 = vmatprep.subr.bf16.mxu0 %v2990_v13 }
 0x3e8   : > { %2812 = vmatpush3.bf16.msra.mxu1 %v2972_v20  ;;  %v2996_v20 = vld [vmem:[%s3787_s18 + $0x84] ss:$16 sps:$4 sm:$0xff]  }
 0x3e9   : > { %2813 = vmatprep.subr.bf16.mxu1 %v2973_v21  ;;  %1721 = vmatpush1.bf16.msra.mxu0 %v2988_v18  ;;  %v3027_v18 = vld [vmem:[%s3789_s14 + $0xb8] sm:$0xff]  }
 0x3ea   : > { %1722 = vmatprep.subr.bf16.mxu0 %v2996_v20  ;;  %v3029_v20 = vld [vmem:[%s3789_s14 + $0xf0] sm:$0xff]  }
 0x3ec   : > { %2814 = vmatpush3.bf16.msra.mxu1 %v2973_v21  ;;  %v2999_v21 = vld [vmem:[%s3787_s18 + $0x8c] ss:$16 sps:$4 sm:$0xff]  }
 0x3ed   : > { %2815 = vmatprep.subr.bf16.mxu1 %v2974_v22 }
 0x3f0   : > { %2816 = vmatpush3.bf16.msra.mxu1 %v2974_v22  ;;  %v2994_v22 = vld [vmem:[%s3787_s18 + $0x80] ss:$16 sps:$4 sm:$0xff]  }
 0x3f1   : > { %2817 = vmatprep.subr.bf16.mxu1 %v2975_v23  ;;  %1723 = vmatpush1.bf16.msra.mxu0 %v2994_v22  ;;  %v3031_v22 = vld [vmem:[%s3789_s14 + $0xb0] sm:$0xff]  }
 0x3f4   : > { %2818 = vmatpush3.bf16.msra.mxu1 %v2975_v23  ;;  %v2997_v23 = vld [vmem:[%s3787_s18 + $0x88] ss:$16 sps:$4 sm:$0xff]  }
 0x3f5   : > { %1769 = vmatprep.subr.bf16.mxu1 %v2981_v57 }
 0x497   : > { %v1256_v26 = vpop.f32.mrf.mxu1 }
 0x499   : > { %v2795_v27 = vpop.f32.mrf.mxu1 }
 0x49a   : > { %v3002_v27 = vld [vmem:[%s3787_s18 + $0x64] ss:$16 sps:$4 sm:$0xff]  }
 0x49b   : > { %v1259_v28 = vpop.f32.mrf.mxu1  ;;  %1724 = vmatprep.subr.bf16.mxu0 %v3002_v27 }
 0x49c   : > { %v1307_v31 = vpack.c.bf16 %v1259_v28, %v1256_v26  ;;  %v3000_v26 = vld [vmem:[%s3787_s18 + $0x60] ss:$16 sps:$4 sm:$0xff]   ;;  %v3003_v28 = vld [vmem:[%s3787_s18 + $0x68] ss:$16 sps:$4 sm:$0xff]  }
 0x49d   : > { %v2796_v33 = vpop.f32.mrf.mxu1  ;;  %1725 = vmatpush1.bf16.msra.mxu0 %v3000_v26  ;;  %v3033_v26 = vld [vmem:[%s3789_s14 + $0xe8] sm:$0xff]  }
 0x49e   : > { %2819 = vmatprep.mubr.bf16.mxu1 %v1307_v31  ;;  %v3005_v31 = vld [vmem:[%s3787_s18 + $0x6c] ss:$16 sps:$4 sm:$0xff]   ;;  %v3008_v33 = vld [vmem:[%s3787_s18 + $0x44] ss:$16 sps:$4 sm:$0xff]  }
 0x49f   : > { %v1300_v34 = vpop.f32.mrf.mxu0  ;;  %1726 = vmatprep.subr.bf16.mxu0 %v3008_v33  ;;  %v3036_v33 = vld [vmem:[%s3789_s14 + $0x60] sm:$0xff]  }
 0x4a1   : > { %v2801_v35 = vpop.f32.mrf.mxu0 }
 0x4a2   : > { %v3006_v35 = vld [vmem:[%s3787_s18 + $0x40] ss:$16 sps:$4 sm:$0xff]  }
 0x4a3   : > { %v1303_v37 = vpop.f32.mrf.mxu0  ;;  %1727 = vmatpush1.bf16.msra.mxu0 %v3006_v35  ;;  %v3038_v35 = vld [vmem:[%s3789_s14 + $0x20] sm:$0xff]  }
 0x4a4   : > { %v1308_v38 = vpack.c.bf16 %v1303_v37, %v1300_v34  ;;  %v3011_v34 = vld [vmem:[%s3787_s18 + $0x4c] ss:$16 sps:$4 sm:$0xff]   ;;  %v3009_v37 = vld [vmem:[%s3787_s18 + $0x48] ss:$16 sps:$4 sm:$0xff]  }
 0x4a5   : > { %v2802_v39 = vpop.f32.mrf.mxu0 }
 0x4a6   : > { %2820 = vmatmul.mubr.bf16.vlgmr.msra.gmra.mxu1 %v1308_v38  ;;  %v3014_v38 = vld [vmem:[%s3787_s18 + $0x24] ss:$16 sps:$4 sm:$0xff]   ;;  %v3017_v39 = vld [vmem:[%s3787_s18 + $0x2c] ss:$16 sps:$4 sm:$0xff]  }
 0x4a7   : > { %1801 = vmatprep.mubr.bf16.mxu1 %v3395_v6  ;;  %1770 = vmatpush1.bf16.msra.mxu1 %v2979_v56 }
 0x4a8   : > { %1771 = vmatprep.subr.bf16.mxu1 %v2987_v9  ;;  %1728 = vmatprep.subr.bf16.mxu0 %v3014_v38  ;;  %v3040_v38 = vld [vmem:[%s3789_s14 + $0x58] sm:$0xff]  }
 0x4ab   : > { %1772 = vmatpush1.bf16.msra.mxu1 %v2985_v11 }
 0x4ac   : > { %1773 = vmatprep.subr.bf16.mxu1 %v2993_v15  ;;  %v3026_v15 = vld [vmem:[%s3789_s14 + $0x38] sm:$0xff]  }
 0x4af   : > { %1774 = vmatpush1.bf16.msra.mxu1 %v2991_v19  ;;  %v3028_v19 = vld [vmem:[%s3789_s14 + $0x70] sm:$0xff]  }
 0x4b0   : > { %1775 = vmatprep.subr.bf16.mxu1 %v2999_v21 }
 0x4b3   : > { %1776 = vmatpush1.bf16.msra.mxu1 %v2997_v23  ;;  %v3032_v23 = vld [vmem:[%s3789_s14 + $0x68] sm:$0xff]  }
 0x4b4   : > { %1777 = vmatprep.subr.bf16.mxu1 %v3005_v31  ;;  %v3035_v31 = vld [vmem:[%s3789_s14 + $0xa8] sm:$0xff]  }
 0x4b7   : > { %1778 = vmatpush1.bf16.msra.mxu1 %v3003_v28 }
 0x4b8   : > { %1779 = vmatprep.subr.bf16.mxu1 %v3011_v34  ;;  %v3037_v34 = vld [vmem:[%s3789_s14 + $0xe0] sm:$0xff]  }
 0x4bb   : > { %1780 = vmatpush1.bf16.msra.mxu1 %v3009_v37  ;;  %v3039_v37 = vld [vmem:[%s3789_s14 + $0xa0] sm:$0xff]  }
 0x4bc   : > { %1781 = vmatprep.subr.bf16.mxu1 %v3017_v39  ;;  %v3041_v39 = vld [vmem:[%s3789_s14 + $0xd8] sm:$0xff]  }
 0x566   : > { %v2821_v40 = vpop.f32.mrf.mxu1 }
 0x567   : > { %v1423_v45 = vadd.f32 %v2821_v40, %v2587_v41  ;;  %v3012_v40 = vld [vmem:[%s3787_s18 + $0x20] ss:$16 sps:$4 sm:$0xff]  }
 0x568   : > { %v1414_v42 = vpop.f32.mrf.mxu1  ;;  %1729 = vmatpush1.bf16.msra.mxu0 %v3012_v40  ;;  %v3042_v40 = vld [vmem:[%s3789_s14 + $0x18] sm:$0xff]  }
 0x569   : > { %v1415_v43 = vadd.f32 %v2587_v41, %v1414_v42  ;;  %v1431_v51 = vadd.f32 %v1423_v45, %v3816_v24  ;;  %v3020_v42 = vld [vmem:[%s3787_s18 + $0x4] ss:$16 sps:$4 sm:$0xff]   ;;  %v3021_v45 = vld [vmem:[%s3787_s18 + $0x8] ss:$16 sps:$4 sm:$0xff]  }
 0x56a   : > { %v2822_v44 = vpop.f32.mrf.mxu1  ;;  %1730 = vmatprep.subr.bf16.mxu0 %v3020_v42  ;;  %v3044_v42 = vld [vmem:[%s3789_s14 + $0x50] sm:$0xff]  }
 0x56b   : > { %v1429_v46 = vadd.f32 %v1415_v43, %v3801_v12  ;;  %v1426_v49 = vadd.f32 %v2822_v44, %v2587_v41  ;;  %v3023_v43 = vld [vmem:[%s3787_s18 + $0xc] ss:$16 sps:$4 sm:$0xff]   ;;  %v3018_v44 = vld [vmem:[%s3787_s18] ss:$16 sps:$4 sm:$0xff]  }
 0x56c   : > { %v1417_v47 = vpop.f32.mrf.mxu1  ;;  %1731 = vmatpush1.bf16.msra.mxu0 %v3018_v44  ;;  %v3046_v44 = vld [vmem:[%s3789_s14 + $0x10] sm:$0xff]  }
 0x56d   : > { %v1418_v48 = vadd.f32 %v2587_v41, %v1417_v47  ;;  %1435 = vadd.xlane.f32.xlu0 %v1429_v46  ;;  %v1432_v53 = vadd.f32 %v1426_v49, %v3818_v25  ;;  %v3015_v41 = vld [vmem:[%s3787_s18 + $0x28] ss:$16 sps:$4 sm:$0xff]  }
 0x56e   : > { %1782 = vmatpush1.bf16.msra.mxu1 %v3015_v41  ;;  %v3025_v47 = vld [vmem:[%s3789_s14 + $0xf8] sm:$0xff]  }
 0x56f   : > { %v1430_v50 = vadd.f32 %v1418_v48, %v3804_v14  ;;  %1783 = vmatprep.subr.bf16.mxu1 %v3023_v43  ;;  %v3043_v41 = vld [vmem:[%s3789_s14 + $0x98] sm:$0xff]   ;;  %v3045_v43 = vld [vmem:[%s3789_s14 + $0xd0] sm:$0xff]  }
 0x571   : > { %1437 = vadd.xlane.f32.xlu1 %v1430_v50  ;;  %1439 = vadd.xlane.f32.xlu0 %v1431_v51 }
 0x572   : > { %1784 = vmatpush1.bf16.msra.mxu1 %v3021_v45  ;;  %v3047_v45 = vld [vmem:[%s3789_s14 + $0x90] sm:$0xff]  }
 0x573   : > { %2731 = vmatprep.subr.bf16.mxu1 %v3025_v47  ;;  %v3049_v47 = vld [vmem:[%s3789_s14 + $0xc8] sm:$0xff]  }
 0x575   : > { %1441 = vadd.xlane.f32.xlu1 %v1432_v53 }
 0x5f6   : > { %v1436_v12 = vpop.xlane.xlu0 %1435 }
 0x5f7   : > { %v1444_v58 = vmul.f32 0.0078125, %v1436_v12 }
 0x5f9   : > { %v3909_v59 = vsub.f32 %v1429_v46, %v1444_v58  ;;  %v3024_v46 = vld [vmem:[%s3789_s14 + $0x78] sm:$0xff]  }
 0x5fa   : > { %v1438_v14 = vpop.xlane.xlu1 %1437  ;;  %v1440_v60 = vpop.xlane.xlu0 %1439  ;;  %2703 = vmatprep.subr.bf16.mxu0 %v3024_v46  ;;  %v3048_v46 = vld [vmem:[%s3789_s14 + $0x48] sm:$0xff]  }
 0x5fb   : > { %v1445_v24 = vmul.f32 0.0078125, %v1438_v14  ;;  %v1446_v61 = vmul.f32 0.0078125, %v1440_v60  ;;  %v1452_v25 = vmul.f32 %v3909_v59, %v3909_v59 }
 0x5fd   : > { %v3913_v62 = vsub.f32 %v1430_v50, %v1445_v24  ;;  %v3915_v63 = vsub.f32 %v1431_v51, %v1446_v61  ;;  %1456 = vadd.xlane.f32.xlu0 %v1452_v25  ;;  %v2596_v61 = vld [vmem:[%s4159_s30] ss:$0 sm:$0xff] }
 0x5fe   : > { %v1442_v0 = vpop.xlane.xlu1 %1441 }
 0x5ff   : > { %v1447_v1 = vmul.f32 0.0078125, %v1442_v0  ;;  %v1453_v2 = vmul.f32 %v3913_v62, %v3913_v62  ;;  %v1454_v32 = vmul.f32 %v3915_v63, %v3915_v63 }
 0x601   : > { %v3921_v3 = vsub.f32 %v1432_v53, %v1447_v1  ;;  %1458 = vadd.xlane.f32.xlu1 %v1453_v2  ;;  %1460 = vadd.xlane.f32.xlu0 %v1454_v32  ;;  %v2597_v32 = vld [vmem:[%s760_s5] ss:$0 sm:$0xff] }
 0x603   : > { %v1455_v4 = vmul.f32 %v3921_v3, %v3921_v3 }
 0x605   : > { %1462 = vadd.xlane.f32.xlu1 %v1455_v4 }
 0x686   : > { %v1457_v48 = vpop.xlane.xlu0 %1456 }
 0x687   : > { %v1464_v49 = vmul.f32 0.0078125, %v1457_v48  ;;  %v3050_v48 = vld [vmem:[%s3789_s14 + $0x8] sm:$0xff]  }
 0x689   : > { %v1468_v50 = vadd.f32 1e-05, %v1464_v49  ;;  %v3051_v49 = vld [vmem:[%s3789_s14 + $0x88] sm:$0xff]  }
 0x68a   : > { %v1459_v51 = vpop.xlane.xlu1 %1458  ;;  %v1461_v53 = vpop.xlane.xlu0 %1460 }
 0x68b   : > { %3072 = vrsqrt.f32 %v1468_v50  ;;  %v1465_v54 = vmul.f32 0.0078125, %v1459_v51  ;;  %v1466_v55 = vmul.f32 0.0078125, %v1461_v53  ;;  %v3052_v50 = vld [vmem:[%s3789_s14 + $0x40] sm:$0xff]  }
 0x68c   : > { %v3053_v51 = vld [vmem:[%s3789_s14 + $0xc0] sm:$0xff]  }
 0x68d   : > { %v1469_v56 = vadd.f32 1e-05, %v1465_v54  ;;  %v1470_v57 = vadd.f32 1e-05, %v1466_v55  ;;  %v3054_v53 = vld [vmem:[%s3789_s14] sm:$0xff]   ;;  %v1550_v55 = vsub.s32 3, %v3829_v29 }
 0x68e   : > { %v1463_v12 = vpop.xlane.xlu1 %1462  ;;  %v3055_v54 = vld [vmem:[%s3789_s14 + $0x80] sm:$0xff]  }
 0x68f   : > { %3074 = vrsqrt.f32 %v1469_v56  ;;  %v1467_v58 = vmul.f32 0.0078125, %v1463_v12  ;;  %v1534_v56 = vld [vmem:[%s3769_s6] sm:$0xf] }
 0x690   : > { %3076 = vrsqrt.f32 %v1470_v57 }
 0x691   : > { %v1471_v14 = vadd.f32 1e-05, %v1467_v58  ;;  %v1543_v58 = vrot.slane %v1534_v56, %v833_v30 }
 0x693   : > { %3078 = vrsqrt.f32 %v1471_v14  ;;  %v1551_v14 = vrot.slane %v1534_v56, %v1550_v55 }
 0x698   : > { %v3073_v60 = vpop.eup %3072 }
 0x699   : > { %v1476_v24 = vmul.f32 %v3073_v60, %v3909_v59  ;;  %v1539_v60 = vrot.slane %v1534_v56, %v829_v36 }
 0x69b   : > { %v1486_v1 = vmul.f32 %v2596_v61, %v1476_v24  ;;  %v1547_v24 = vrot.slane %v1534_v56, %v837_v52 }
 0x69c   : > { %v3075_v25 = vpop.eup %3074 }
 0x69d   : > { %v1477_v0 = vmul.f32 %v3075_v25, %v3913_v62  ;;  %v3077_v2 = vpop.eup %3076  ;;  %v3967_v5 = vadd.f32 %v2597_v32, %v1486_v1 }
 0x69e   : > { %v1478_v10 = vmul.f32 %v3077_v2, %v3915_v63 }
 0x69f   : > { %v1487_v4 = vmul.f32 %v2596_v61, %v1477_v0 }
 0x6a0   : > { %v3079_v59 = vpop.eup %3078  ;;  %v1488_v21 = vmul.f32 %v2596_v61, %v1478_v10 }
 0x6a1   : > { %v3969_v9 = vadd.f32 %v2597_v32, %v1487_v4  ;;  %v1479_v11 = vmul.f32 %v3079_v59, %v3921_v3  ;;  %v3030_v3 = vld [vmem:[%s3789_s14 + $0x30] sm:$0xff]  }
 0x6a2   : > { %v3987_v27 = vadd.f32 %v2597_v32, %v1488_v21 }
 0x6a3   : > { %v1500_v62 = vpack.c.bf16 %v3969_v9, %v3967_v5  ;;  %v1489_v13 = vmul.f32 %v2596_v61, %v1479_v11 }
 0x6a5   : > { %1749 = vmatmul.mubr.bf16.vlgmr.msra.gmra.mxu0 %v1500_v62  ;;  %1802 = vmatmul.mubr.bf16.vlgmr.msra.gmra.mxu1 %v1500_v62  ;;  %v3981_v63 = vadd.f32 %v2597_v32, %v1489_v13 }
 0x6a6   : > { %1758 = vmatprep.mubr.bf16.mxu0 %v3395_v6  ;;  %1811 = vmatprep.mubr.bf16.mxu1 %v3395_v6  ;;  %v3034_v6 = vld [vmem:[%s3789_s14 + $0x28] sm:$0xff]  }
 0x6a7   : > { %2704 = vmatpush3.bf16.msra.mxu0 %v3026_v15  ;;  %2732 = vmatpush3.bf16.msra.mxu1 %v3027_v18  ;;  %v1501_v28 = vpack.c.bf16 %v3981_v63, %v3987_v27 }
 0x6a8   : > { %2705 = vmatprep.subr.bf16.mxu0 %v3028_v19  ;;  %2733 = vmatprep.subr.bf16.mxu1 %v3029_v20 }
 0x6ab   : > { %2706 = vmatpush3.bf16.msra.mxu0 %v3030_v3  ;;  %2734 = vmatpush3.bf16.msra.mxu1 %v3031_v22 }
 0x6ac   : > { %2707 = vmatprep.subr.bf16.mxu0 %v3032_v23  ;;  %2735 = vmatprep.subr.bf16.mxu1 %v3033_v26 }
 0x6ad   : > { %1759 = vmatmul.mubr.bf16.gmra.mxu0 %v1501_v28  ;;  %1812 = vmatmul.mubr.bf16.gmra.mxu1 %v1501_v28 }
 0x6af   : > { %2708 = vmatpush3.bf16.msra.mxu0 %v3034_v6  ;;  %2736 = vmatpush3.bf16.msra.mxu1 %v3035_v31 }
 0x6b0   : > { %2709 = vmatprep.subr.bf16.mxu0 %v3036_v33  ;;  %2737 = vmatprep.subr.bf16.mxu1 %v3037_v34 }
 0x6b3   : > { %2710 = vmatpush3.bf16.msra.mxu0 %v3038_v35  ;;  %2738 = vmatpush3.bf16.msra.mxu1 %v3039_v37 }
 0x6b4   : > { %2711 = vmatprep.subr.bf16.mxu0 %v3040_v38  ;;  %2739 = vmatprep.subr.bf16.mxu1 %v3041_v39 }
 0x6b7   : > { %2712 = vmatpush3.bf16.msra.mxu0 %v3042_v40  ;;  %2740 = vmatpush3.bf16.msra.mxu1 %v3043_v41 }
 0x6b8   : > { %2713 = vmatprep.subr.bf16.mxu0 %v3044_v42  ;;  %2741 = vmatprep.subr.bf16.mxu1 %v3045_v43 }
 0x6bb   : > { %2714 = vmatpush3.bf16.msra.mxu0 %v3046_v44  ;;  %2742 = vmatpush3.bf16.msra.mxu1 %v3047_v45 }
 0x6bc   : > { %2715 = vmatprep.subr.bf16.mxu0 %v3048_v46  ;;  %2743 = vmatprep.subr.bf16.mxu1 %v3049_v47 }
 0x6bf   : > { %2716 = vmatpush3.bf16.msra.mxu0 %v3050_v48  ;;  %2744 = vmatpush3.bf16.msra.mxu1 %v3051_v49 }
 0x6c0   : > { %2717 = vmatprep.subr.bf16.mxu0 %v3052_v50  ;;  %2745 = vmatprep.subr.bf16.mxu1 %v3053_v51 }
 0x6c3   : > { %2718 = vmatpush3.bf16.msra.mxu0 %v3054_v53  ;;  %2746 = vmatpush3.bf16.msra.mxu1 %v3055_v54 }
 0x765   : > { %v1750_v57 = vpop.f32.mrf.mxu0  ;;  %v1803_v12 = vpop.f32.mrf.mxu1 }
 0x766   : > { %v1751_v10 = vadd.f32 %v1750_v57, %v1539_v60  ;;  %v1804_v11 = vadd.f32 %v1803_v12, %v1547_v24 }
 0x767   : > { %v1752_v61 = vpop.f32.mrf.mxu0  ;;  %v1805_v25 = vpop.f32.mrf.mxu1 }
 0x768   : > { %v1753_v2 = vadd.f32 %v1752_v61, %v1543_v58  ;;  %v1806_v32 = vadd.f32 %v1805_v25, %v1551_v14  ;;  %v1822_v22 = vmax.f32 %v1751_v10, 0.0  ;;  %v1824_v23 = vmax.f32 %v1804_v11, 0.0 }
 0x769   : > { %v1754_v0 = vpop.f32.mrf.mxu0  ;;  %v1807_v1 = vpop.f32.mrf.mxu1 }
 0x76a   : > { %v1755_v4 = vadd.f32 %v1754_v0, %v1539_v60  ;;  %v1808_v59 = vadd.f32 %v1807_v1, %v1547_v24  ;;  %v1823_v29 = vmax.f32 %v1753_v2, 0.0  ;;  %v1825_v52 = vmax.f32 %v1806_v32, 0.0 }
 0x76b   : > { %v1756_v62 = vpop.f32.mrf.mxu0  ;;  %v1809_v13 = vpop.f32.mrf.mxu1 }
 0x76c   : > { %v1757_v30 = vadd.f32 %v1756_v62, %v1543_v58  ;;  %v1810_v15 = vadd.f32 %v1809_v13, %v1551_v14  ;;  %v1826_v18 = vmax.f32 %v1755_v4, 0.0  ;;  %v1828_v19 = vmax.f32 %v1808_v59, 0.0 }
 0x76d   : > { %v1760_v36 = vpop.f32.mrf.mxu0  ;;  %v1813_v20 = vpop.f32.mrf.mxu1 }
 0x76e   : > { %v1827_v21 = vmax.f32 %v1757_v30, 0.0  ;;  %v1829_v3 = vmax.f32 %v1810_v15, 0.0  ;;  %v1838_v33 = vpack.c.bf16 %v1826_v18, %v1822_v22  ;;  %v1840_v34 = vpack.c.bf16 %v1828_v19, %v1824_v23 }
 0x76f   : > { %v1762_v26 = vpop.f32.mrf.mxu0  ;;  %v1815_v28 = vpop.f32.mrf.mxu1  ;;  %v1761_v42 = vadd.f32 %v1760_v36, %v1539_v60  ;;  %v1814_v43 = vadd.f32 %v1813_v20, %v1547_v24 }
 0x770   : > { %v1839_v6 = vpack.c.bf16 %v1827_v21, %v1823_v29  ;;  %v1841_v31 = vpack.c.bf16 %v1829_v3, %v1825_v52  ;;  %v1763_v35 = vadd.f32 %v1762_v26, %v1543_v58  ;;  %v1816_v39 = vadd.f32 %v1815_v28, %v1551_v14 }
 0x771   : > { %v1764_v37 = vpop.f32.mrf.mxu0  ;;  %v1817_v38 = vpop.f32.mrf.mxu1  ;;  %v1830_v55 = vmax.f32 %v1761_v42, 0.0  ;;  %v1832_v56 = vmax.f32 %v1814_v43, 0.0 }
 0x772   : > { %v1765_v40 = vadd.f32 %v1764_v37, %v1539_v60  ;;  %v1818_v41 = vadd.f32 %v1817_v38, %v1547_v24  ;;  %2141 = vmatprep.mubr.bf16.mxu0 %v1839_v6  ;;  %2190 = vmatprep.mubr.bf16.mxu1 %v1841_v31  ;;  %v1831_v50 = vmax.f32 %v1763_v35, 0.0  ;;  %v1833_v51 = vmax.f32 %v1816_v39, 0.0 }
 0x773   : > { %v1766_v44 = vpop.f32.mrf.mxu0  ;;  %v1819_v45 = vpop.f32.mrf.mxu1  ;;  %2142 = vmatmul.mubr.bf16.vlgmr.msra.gmra.mxu0 %v1838_v33  ;;  %2191 = vmatmul.mubr.bf16.vlgmr.msra.gmra.mxu1 %v1840_v34 }
 0x774   : > { %v1767_v46 = vadd.f32 %v1766_v44, %v1543_v58  ;;  %v1820_v47 = vadd.f32 %v1819_v45, %v1551_v14  ;;  %v1834_v48 = vmax.f32 %v1765_v40, 0.0  ;;  %v1836_v49 = vmax.f32 %v1818_v41, 0.0  ;;  %v2630_v14 = vld [vmem:[%s767_s9] ss:$0 sm:$0xff] }
 0x776   : > { %v1835_v53 = vmax.f32 %v1767_v46, 0.0  ;;  %v1837_v54 = vmax.f32 %v1820_v47, 0.0  ;;  %v1842_v61 = vpack.c.bf16 %v1834_v48, %v1830_v55  ;;  %v1844_v60 = vpack.c.bf16 %v1836_v49, %v1832_v56 }
 0x778   : > { %v1843_v57 = vpack.c.bf16 %v1835_v53, %v1831_v50  ;;  %v1845_v12 = vpack.c.bf16 %v1837_v54, %v1833_v51 }
 0x77a   : > { %2149 = vmatprep.mubr.bf16.mxu0 %v1843_v57  ;;  %2198 = vmatprep.mubr.bf16.mxu1 %v1845_v12 }
 0x77b   : > { %2150 = vmatmul.mubr.bf16.gmra.mxu0 %v1842_v61  ;;  %2199 = vmatmul.mubr.bf16.gmra.mxu1 %v1844_v60 }
 0x833   : > { %v2719_v24 = vpop.f32.mrf.mxu0  ;;  %v2747_v58 = vpop.f32.mrf.mxu1 }
 0x835   : > { %v2720_v25 = vpop.f32.mrf.mxu0  ;;  %v2748_v0 = vpop.f32.mrf.mxu1 }
 0x836   : > { %v2721_v1 = vadd.f32 %v2720_v25, %v2719_v24  ;;  %v2749_v59 = vadd.f32 %v2748_v0, %v2747_v58 }
 0x837   : > { %v2722_v2 = vpop.f32.mrf.mxu0  ;;  %v2750_v32 = vpop.f32.mrf.mxu1 }
 0x838   : > { %v2144_v4 = vadd.f32 %v2721_v1, %v2630_v14 }
 0x839   : > { %v2723_v10 = vpop.f32.mrf.mxu0  ;;  %v2751_v11 = vpop.f32.mrf.mxu1 }
 0x83a   : > { %v2193_v62 = vadd.f32 %v2749_v59, %v2144_v4  ;;  %v2724_v13 = vadd.f32 %v2723_v10, %v2722_v2  ;;  %v2752_v19 = vadd.f32 %v2751_v11, %v2750_v32  ;;  %v2663_v2 = vld [vmem:[%s770_s3] ss:$0 sm:$0xff] }
 0x83b   : > { %v2725_v30 = vpop.f32.mrf.mxu0  ;;  %v2753_v15 = vpop.f32.mrf.mxu1  ;;  %v2664_v4 = vld [vmem:[%s773_s11] ss:$0 sm:$0xff] }
 0x83c   : > { %v2147_v18 = vadd.f32 %v2724_v13, %v2630_v14  ;;  %v2207_v36 = vadd.f32 %v2193_v62, %v3967_v5 }
 0x83d   : > { %v2726_v20 = vpop.f32.mrf.mxu0  ;;  %v2754_v29 = vpop.f32.mrf.mxu1 }
 0x83e   : > { %v2196_v52 = vadd.f32 %v2752_v19, %v2147_v18  ;;  %v2727_v21 = vadd.f32 %v2726_v20, %v2725_v30  ;;  %2213 = vadd.xlane.f32.xlu0 %v2207_v36  ;;  %v2755_v26 = vadd.f32 %v2754_v29, %v2753_v15 }
 0x83f   : > { %v2728_v3 = vpop.f32.mrf.mxu0  ;;  %v2756_v22 = vpop.f32.mrf.mxu1 }
 0x840   : > { %v2152_v23 = vadd.f32 %v2727_v21, %v2630_v14  ;;  %v2208_v28 = vadd.f32 %v2196_v52, %v3969_v9 }
 0x841   : > { %v2729_v6 = vpop.f32.mrf.mxu0  ;;  %v2757_v31 = vpop.f32.mrf.mxu1 }
 0x842   : > { %v2201_v33 = vadd.f32 %v2755_v26, %v2152_v23  ;;  %v2730_v34 = vadd.f32 %v2729_v6, %v2728_v3  ;;  %2215 = vadd.xlane.f32.xlu1 %v2208_v28  ;;  %v2758_v37 = vadd.f32 %v2757_v31, %v2756_v22 }
 0x844   : > { %v2155_v35 = vadd.f32 %v2730_v34, %v2630_v14  ;;  %v2209_v5 = vadd.f32 %v2201_v33, %v3987_v27 }
 0x846   : > { %v2204_v38 = vadd.f32 %v2758_v37, %v2155_v35  ;;  %2217 = vadd.xlane.f32.xlu0 %v2209_v5 }
 0x848   : > { %v2210_v39 = vadd.f32 %v2204_v38, %v3981_v63 }
 0x84a   : > { %2219 = vadd.xlane.f32.xlu1 %v2210_v39 }
 0x8c7   : > { %v2214_v40 = vpop.xlane.xlu0 %2213 }
 0x8c8   : > { %v2221_v41 = vmul.f32 0.0078125, %v2214_v40 }
 0x8ca   : > { %v2225_v42 = vsub.f32 %v2207_v36, %v2221_v41 }
 0x8cb   : > { %v2216_v43 = vpop.xlane.xlu1 %2215 }
 0x8cc   : > { %v2222_v44 = vmul.f32 0.0078125, %v2216_v43  ;;  %v2229_v9 = vmul.f32 %v2225_v42, %v2225_v42 }
 0x8ce   : > { %v2226_v45 = vsub.f32 %v2208_v28, %v2222_v44  ;;  %2233 = vadd.xlane.f32.xlu0 %v2229_v9 }
 0x8cf   : > { %v2218_v46 = vpop.xlane.xlu0 %2217 }
 0x8d0   : > { %v2223_v47 = vmul.f32 0.0078125, %v2218_v46  ;;  %v2230_v48 = vmul.f32 %v2226_v45, %v2226_v45 }
 0x8d2   : > { %v2227_v49 = vsub.f32 %v2209_v5, %v2223_v47  ;;  %2235 = vadd.xlane.f32.xlu1 %v2230_v48 }
 0x8d3   : > { %v2220_v50 = vpop.xlane.xlu1 %2219 }
 0x8d4   : > { %v2224_v27 = vmul.f32 0.0078125, %v2220_v50  ;;  %v2231_v51 = vmul.f32 %v2227_v49, %v2227_v49 }
 0x8d6   : > { %v2228_v53 = vsub.f32 %v2210_v39, %v2224_v27  ;;  %2237 = vadd.xlane.f32.xlu0 %v2231_v51 }
 0x8d8   : > { %v2232_v63 = vmul.f32 %v2228_v53, %v2228_v53 }
 0x8da   : > { %2239 = vadd.xlane.f32.xlu1 %v2232_v63 }
 0x957   : > { %v2234_v54 = vpop.xlane.xlu0 %2233 }
 0x958   : > { %v2241_v55 = vmul.f32 0.0078125, %v2234_v54 }
 0x95a   : > { %v2245_v56 = vadd.f32 1e-05, %v2241_v55 }
 0x95b   : > { %v2236_v57 = vpop.xlane.xlu1 %2235 }
 0x95c   : > { %3080 = vrsqrt.f32 %v2245_v56  ;;  %v2242_v12 = vmul.f32 0.0078125, %v2236_v57 }
 0x95e   : > { %v2246_v61 = vadd.f32 1e-05, %v2242_v12 }
 0x95f   : > { %v2238_v60 = vpop.xlane.xlu0 %2237 }
 0x960   : > { %3082 = vrsqrt.f32 %v2246_v61  ;;  %v2243_v24 = vmul.f32 0.0078125, %v2238_v60 }
 0x962   : > { %v2247_v58 = vadd.f32 1e-05, %v2243_v24 }
 0x963   : > { %v2240_v14 = vpop.xlane.xlu1 %2239 }
 0x964   : > { %3084 = vrsqrt.f32 %v2247_v58  ;;  %v2244_v25 = vmul.f32 0.0078125, %v2240_v14 }
 0x966   : > { %v2248_v0 = vadd.f32 1e-05, %v2244_v25 }
 0x968   : > { %3086 = vrsqrt.f32 %v2248_v0 }
 0x969   : > { %v3081_v1 = vpop.eup %3080 }
 0x96a   : > { %v2253_v32 = vmul.f32 %v3081_v1, %v2225_v42 }
 0x96c   : > { %v2263_v59 = vmul.f32 %v2663_v2, %v2253_v32 }
 0x96d   : > { %v3083_v10 = vpop.eup %3082 }
 0x96e   : > { %v2273_v11 = vadd.f32 %v2664_v4, %v2263_v59  ;;  %v2254_v62 = vmul.f32 %v3083_v10, %v2226_v45 }
 0x970   : > { %2277 = vst [vmem:[#allocation12] sm:$0xff] %v2273_v11  ;;  %v2264_v13 = vmul.f32 %v2663_v2, %v2254_v62 }
 0x971   : > { %v3085_v30 = vpop.eup %3084 }
 0x972   : > { %v2274_v15 = vadd.f32 %v2664_v4, %v2264_v13  ;;  %v2255_v18 = vmul.f32 %v3085_v30, %v2227_v49 }
 0x974   : > { %2278 = vst [vmem:[#allocation12 + $0x8] sm:$0xff] %v2274_v15  ;;  %v2265_v19 = vmul.f32 %v2663_v2, %v2255_v18 }
 0x975   : > { %v3087_v36 = vpop.eup %3086 }
 0x976   : > { %v2275_v20 = vadd.f32 %v2664_v4, %v2265_v19  ;;  %v2256_v29 = vmul.f32 %v3087_v36, %v2228_v53 }
 0x978   : > { %2279 = vst [vmem:[#allocation12 + $0x10] sm:$0xff] %v2275_v20  ;;  %v2266_v52 = vmul.f32 %v2663_v2, %v2256_v29  ;;  %2284 = sbr.rel (%p2665_p9) target bundleno = 2431 (0x97f), region = 112 }
 0x97a   : > { %v2276_v21 = vadd.f32 %v2664_v4, %v2266_v52 }
 0x97c   : > { %2280 = vst [vmem:[#allocation12 + $0x18] sm:$0xff] %v2276_v21 }
 0x97d   : > { %2285 = vst.msk [vmem:[#allocation13] sm:$0xff] %vm1172_vm1, %v3873_v7  ;;  %2286 = vst.msk [vmem:[#allocation13 + $0x8] sm:$0xff] %vm1172_vm1, %v3875_v8 }
 0x97e   : > { %2287 = vst.msk [vmem:[#allocation13 + $0x10] sm:$0xff] %vm1172_vm1, %v3882_v16  ;;  %2288 = vst.msk [vmem:[#allocation13 + $0x18] sm:$0xff] %vm1172_vm1, %v3884_v17 }
 0x97f PF: > { %p2883_p8 = scmp.eq.s32.totalorder %s3501_s22, 1  ;;  %s3398_s3 = smov [#allocation12]  }
 0x980   : > { %s2295_s16 = sshll.u32 %s3398_s3, 4  ;;  %s2296_s16 = int_to_ptr.vmem [resolvable:$true] %s2295_s16 }
 0x981   : > { %s3280_s11 = scalar_lea.vmem %s2296_s16, 512  ;;  %p3287_p13 = scmp.lt.s32.totalorder %s2296_s16, %s2296_s16 }
 0x982   : > { %p3281_p10 = scmp.ne.s32.totalorder %s2296_s16, %s3280_s11  ;;  %p3288_p5 = scmp.lt.s32.totalorder %s3280_s11, %s3280_s11 }
 0x984   : > { %p3282_p12 = pnand %p3281_p10, %p2883_p8  ;;  %p3289_p2 = por %p3288_p5, %p3287_p13 }
 0x986   : > { %p3283_p1 = pneg %p3282_p12 }
 0x988   : > { %p3290_p3 = pnand %p3289_p2, %p3283_p1 }
 0x98a   : > { %3293 = shalt.err (!%p3290_p3)
}
 0x98b   : > { %s3399_s26 = smov 128   ;;  %s3400_s18 = smov 8  }
 0x98c   : > { %s4164_s0 = sld [smem:[#allocation34_spill]]  ;;  %s3401_s2 = smov [#allocation13]  }
 0x98d   : > { %s2308_s15 = sshll.u32 %s3401_s2, 4  ;;  %s2309_s15 = int_to_ptr.vmem [resolvable:$true] %s2308_s15 }
 0x98e   : > { %s3304_s7 = scalar_lea.vmem %s2309_s15, 512  ;;  %p3311_p4 = scmp.lt.s32.totalorder %s2309_s15, %s2309_s15 }
 0x98f   : > { %p3305_p7 = scmp.ne.s32.totalorder %s2309_s15, %s3304_s7  ;;  %p3312_p6 = scmp.lt.s32.totalorder %s3304_s7, %s3304_s7 }
 0x991   : > { %p3306_p11 = pnand %p3305_p7, %p2883_p8  ;;  %p3313_p9 = por %p3312_p6, %p3311_p4 }
 0x992   : > { %2848 = dma.vmem_to_hbm [thread:$0]  (%p2883_p8), %s2296_s16, 512, %s4164_s0, [#allocation4], %s3399_s26, %s3399_s26, %s3400_s18  }
 0x993   : > { %p3307_p0 = pneg %p3306_p11 }
 0x995   : > { %p3314_p10 = pnand %p3313_p9, %p3307_p0 }
 0x997   : > { %3317 = shalt.err (!%p3314_p10)
}
 0x998   : > { %s4165_s30 = sld [smem:[#allocation35_spill]] }
 0x99e   : > { %2850 = dma.vmem_to_hbm [thread:$0]  (%p2883_p8), %s2309_s15, 512, %s4165_s30, [#allocation14], %s3399_s26, %s3399_s26, %s3400_s18  }
 0x99f   : > { %3357 = dma.done.wait (%p2883_p8), [#allocation4], 512  }
 0x9a0   : > { %3359 = vsyncadd (%p2883_p8), [#allocation4], 4294966784 }
 0x9a1   : > { %3361 = dma.done.wait (%p2883_p8), [#allocation14], 512  }
 0x9a2   : > { %3363 = vsyncadd (%p2883_p8), [#allocation14], 4294966784 }
 0x9a3 PF: > { %s4166_s21 = sld [smem:[#allocation21_spill]]  ;;  %s4169_s18 = smov %s3370_s19 }
 0x9a4   : > { %s4167_s25 = sld [smem:[#allocation20_spill]] }
 0x9a5   : > { %s4168_s20 = sld [smem:[#allocation22_spill]] }
 0x9a9   : > { %p27_p12 = scmp.ge.s32.totalorder %s4166_s21, 4  }
 0x9aa   : > { %s4170_s19 = smov %s4167_s25 }
 0x9ab   :  { %29 = sbr.rel (!%p27_p12) target bundleno = 19 (0x13), region = 201 }
 0x9b0   :  { %2328 = vsyncpa [#allocation3], 1 }
 0x9b1   :  { %2330 = vsyncpa [#allocation3 + $0x1], 1 }
 0x9b2   :  { %2331 = vsyncpa [#allocation6], 1 }
 0x9b3   :  { %2332 = vsyncpa [#allocation4], 1 }
 0x9b4   :  { %2334 = vsyncpa [#allocation4 + $0x1], 1 }
 0x9b5   :  { %2335 = vsyncpa [#allocation14], 1 }

</bundles_post_ra>
